<compile_context>
chip_gen: v5e
topology: v5e:2x2
jax: 0.10.0
libtpu: 0.0.40
codegen_flags: <defaults>
</compile_context>

<pallas_src>
import functools
import numpy as np
import jax
import jax.numpy as jnp
from jax import lax
from jax.experimental import pallas as pl
from jax.experimental.pallas import tpu as pltpu


CONV_CFG = [(3, 1), (3, 2), (3, 3), (1, 1)]   # (kernel, dilation); stride = 4
STRIDE = 4
MAX_ROW_TILE = 1024                            # seq_len tile (sweepable)


def _round_up(x, m):
    return ((x + m - 1) // m) * m


def adaptive_avg_pool_matrix(in_len, out_len):
    """Exact nn.AdaptiveAvgPool1d as an [out_len, in_len] averaging matrix."""
    P = np.zeros((out_len, in_len), np.float32)
    for i in range(out_len):
        lo = (i * in_len) // out_len
        hi = -(-((i + 1) * in_len) // out_len)   # ceil
        P[i, lo:hi] = 1.0 / (hi - lo)
    return P


# ------------------------------ Pallas kernels ------------------------------

def _make_fused_kernel(seq_len, row_tile, n_total, n_terms, b1, b2):
    """Pooling reduction + fc_up + convs + pool2 + fused fc_down heads."""

    def kernel(lo_ref, hi_ref, inv_ref, x_ref, wup_ref, bup_ref,
               wconv_ref, econv_ref, bconv_ref, p2t_ref,
               wdn_ref, bdn_ref, gam_ref, bet_ref, out_ref, acc_ref):
        k = pl.program_id(0)

        @pl.when(k == 0)
        def _():
            acc_ref[...] = jnp.zeros_like(acc_ref)

        # ---- frame->shot pooling tile generated in-kernel (no P in HBM) ----
        col = k * row_tile + lax.broadcasted_iota(
            jnp.int32, (n_total, row_tile), 1)
        p_tile = jnp.where((col >= lo_ref[...]) & (col < hi_ref[...]),
                           inv_ref[...], 0.0)
        # mask rows of the (possibly partial) last x tile
        rowg = k * row_tile + lax.broadcasted_iota(jnp.int32, x_ref.shape, 0)
        xv = jnp.where(rowg < seq_len, x_ref[...], 0.0)
        acc_ref[...] += jnp.dot(p_tile, xv, preferred_element_type=jnp.float32)

        @pl.when(k == pl.num_programs(0) - 1)
        def _():
            # fc_up after pooling (pooling is linear; each row sums to 1)
            s_all = jnp.dot(acc_ref[...], wup_ref[...],
                            preferred_element_type=jnp.float32) + bup_ref[...]

            # 12 Conv1d's as (W_tap @ s) @ E_tap with branch-block-diag W_tap
            cat = bconv_ref[...]                               # [n_total, L_pad]
            for t in range(n_terms):
                cat = cat + jnp.dot(
                    jnp.dot(wconv_ref[t], s_all,
                            preferred_element_type=jnp.float32),
                    econv_ref[t], preferred_element_type=jnp.float32)
            cat = jnp.maximum(cat, 0.0)                        # ReLU after convs

            # AdaptiveAvgPool1d(L_total -> shot_channel)
            pooled = jnp.dot(cat, p2t_ref[...],
                             preferred_element_type=jnp.float32)

            # three fc_down heads fused into one matmul via column banding
            row = lax.broadcasted_iota(jnp.int32, pooled.shape, 0)
            m0 = (row < b1).astype(jnp.float32)
            m1 = ((row >= b1) & (row < b2)).astype(jnp.float32)
            m2 = (row >= b2).astype(jnp.float32)
            banded = jnp.concatenate(
                [pooled * m0, pooled * m1, pooled * m2], axis=-1)
            h = jnp.dot(banded, wdn_ref[...],
                        preferred_element_type=jnp.float32) + bdn_ref[...]
            h = jnp.maximum(h, 0.0)
            mu = jnp.mean(h, axis=-1, keepdims=True)
            xc = h - mu
            var = jnp.mean(xc * xc, axis=-1, keepdims=True)
            out_ref[...] = (xc * lax.rsqrt(var + 1e-5) * gam_ref[...]
                            + bet_ref[...])

    return kernel


def _make_merge_kernel(seq_len, n_total, row_tile):
    """mergePooling (shot index computed in-kernel) + residual add."""
    split = seq_len // n_total   # precondition: seq_len >= n_total (as PyTorch)

    def kernel(x_ref, dn_ref, o_ref):
        i = pl.program_id(0)
        r = i * row_tile + lax.broadcasted_iota(
            jnp.int32, (row_tile, n_total), 0)
        c = lax.broadcasted_iota(jnp.int32, (row_tile, n_total), 1)
        lo = c * split
        hi = jnp.where(c == n_total - 1, jnp.int32(2 ** 30), (c + 1) * split)
        sel = ((r >= lo) & (r < hi)).astype(jnp.float32)
        o_ref[...] = x_ref[...] + jnp.dot(sel, dn_ref[...],
                                          preferred_element_type=jnp.float32)

    return kernel


# ------------------------------ host-side glue ------------------------------

def pack_operands(params, shot_num, shot_channel, input_channel):
    """Pack PyTorch-style params into the stacked arrays the kernels need."""
    branch_n = [shot_num, int(shot_num * 1.5), int(shot_num * 0.5)]
    n_total = sum(branch_n)
    L_outs = [(shot_channel - d * (k - 1) - 1) // STRIDE + 1 for k, d in CONV_CFG]
    L_total = sum(L_outs)
    L_pad = max(_round_up(L_total, 64), 64)       # lane-friendly padding
    seg_off = np.cumsum([0] + L_outs[:-1]).tolist()
    terms = [(c, t) for c, (k, _) in enumerate(CONV_CFG) for t in range(k)]
    T = len(terms)

    # 0/1 position-select matrices: input position -> concatenated slot
    E = np.zeros((T, shot_channel, L_pad), np.float32)
    for ti, (c, t) in enumerate(terms):
        _, d = CONV_CFG[c]
        for l in range(L_outs[c]):
            E[ti, l * STRIDE + t * d, seg_off[c] + l] = 1.0

    # conv tap weights, block-diagonal across the 3 branches; biases per row
    W = np.zeros((T, n_total, n_total), np.float32)
    B = np.zeros((n_total, L_pad), np.float32)
    r0 = 0
    for b, nk in enumerate(branch_n):
        for ti, (c, t) in enumerate(terms):
            W[ti, r0:r0 + nk, r0:r0 + nk] = \
                np.asarray(params["conv_w"][b][c])[:, :, t]
        for c in range(len(CONV_CFG)):
            B[r0:r0 + nk, seg_off[c]:seg_off[c] + L_outs[c]] = \
                np.asarray(params["conv_b"][b][c])[:, None]
        r0 += nk

    # AdaptiveAvgPool1d(L_total -> shot_channel); zero rows for the lane pad
    P2 = np.zeros((L_pad, shot_channel), np.float32)
    P2[:L_total] = adaptive_avg_pool_matrix(L_total, shot_channel).T

    # fc_down heads: vertically stacked weights + per-row bias / LN params
    Wdn = np.concatenate(
        [np.asarray(params["W_down"][b]).T for b in range(3)], axis=0)

    def rows(vals):
        return np.concatenate(
            [np.tile(np.asarray(vals[b])[None, :], (branch_n[b], 1))
             for b in range(3)], axis=0).astype(np.float32)

    ops = dict(
        wup=jnp.asarray(np.asarray(params["W_up"]).T),           # [C_in, C_shot]
        bup=jnp.asarray(np.asarray(params["b_up"])[None, :]),    # [1, C_shot]
        wconv=jnp.asarray(W),                                    # [T, n_tot, n_tot]
        econv=jnp.asarray(E),                                    # [T, C_shot, L_pad]
        bconv=jnp.asarray(B),                                    # [n_tot, L_pad]
        p2t=jnp.asarray(P2),                                     # [L_pad, C_shot]
        wdn=jnp.asarray(Wdn.astype(np.float32)),                 # [3*C_shot, C_in]
        bdn=jnp.asarray(rows(params["b_down"])),                 # [n_tot, C_in]
        gam=jnp.asarray(rows(params["ln_gamma"])),
        bet=jnp.asarray(rows(params["ln_beta"])),
    )
    meta = dict(branch_n=branch_n, n_total=n_total, L_pad=L_pad, n_terms=T)
    return ops, meta


@functools.lru_cache(maxsize=64)
def _shot_segments(seq_len, branch_n):
    """Tiny per-shot (lo, hi, 1/count) vectors; cached per seq_len."""
    lo, hi, inv = [], [], []
    for nk in branch_n:
        for i in range(nk):
            l = (i * seq_len) // nk
            h = -(-((i + 1) * seq_len) // nk)
            lo.append(l); hi.append(h); inv.append(1.0 / (h - l))
    return (jnp.asarray(np.asarray(lo, np.int32)[:, None]),
            jnp.asarray(np.asarray(hi, np.int32)[:, None]),
            jnp.asarray(np.asarray(inv, np.float32)[:, None]))


def shot_level_extraction_forward(seq, ops, meta, shot_num, shot_channel):
    """seq: [1, seq_len, input_channel] -> [1, seq_len, input_channel]."""
    _, seq_len, c_in = seq.shape
    branch_n = meta["branch_n"]
    n_total = meta["n_total"]
    L_pad = meta["L_pad"]
    T = meta["n_terms"]
    c_shot = shot_channel
    b1, b2 = branch_n[0], branch_n[0] + branch_n[1]

    row_tile = min(MAX_ROW_TILE, _round_up(seq_len, 128))
    ksteps = pl.cdiv(seq_len, row_tile)

    seq = seq.astype(jnp.float32)
    seg_lo, seg_hi, seg_inv = _shot_segments(seq_len, tuple(branch_n))

    # ---- kernel 1: pooling reduction + fc_up + convs + pool2 + fc_down heads
    fused = _make_fused_kernel(seq_len, row_tile, n_total, T, b1, b2)
    down = pl.pallas_call(
        fused,
        out_shape=jax.ShapeDtypeStruct((n_total, c_in), jnp.float32),
        grid_spec=pltpu.PrefetchScalarGridSpec(
            num_scalar_prefetch=0,
            grid=(ksteps,),
            in_specs=[
                pl.BlockSpec((n_total, 1), lambda k: (0, 0)),            # seg_lo
                pl.BlockSpec((n_total, 1), lambda k: (0, 0)),            # seg_hi
                pl.BlockSpec((n_total, 1), lambda k: (0, 0)),            # seg_inv
                pl.BlockSpec((None, row_tile, c_in), lambda k: (0, k, 0)),  # seq
                pl.BlockSpec((c_in, c_shot), lambda k: (0, 0)),          # wup
                pl.BlockSpec((1, c_shot), lambda k: (0, 0)),             # bup
                pl.BlockSpec((T, n_total, n_total), lambda k: (0, 0, 0)),
                pl.BlockSpec((T, c_shot, L_pad), lambda k: (0, 0, 0)),
                pl.BlockSpec((n_total, L_pad), lambda k: (0, 0)),
                pl.BlockSpec((L_pad, c_shot), lambda k: (0, 0)),
                pl.BlockSpec((3 * c_shot, c_in), lambda k: (0, 0)),
                pl.BlockSpec((n_total, c_in), lambda k: (0, 0)),         # bdn
                pl.BlockSpec((n_total, c_in), lambda k: (0, 0)),         # gam
                pl.BlockSpec((n_total, c_in), lambda k: (0, 0)),         # bet
            ],
            out_specs=pl.BlockSpec((n_total, c_in), lambda k: (0, 0)),
            scratch_shapes=[pltpu.VMEM((n_total, c_in), jnp.float32)],
        ),
        compiler_params=pltpu.CompilerParams(
            dimension_semantics=("arbitrary",)),
    )(seg_lo, seg_hi, seg_inv, seq, ops["wup"], ops["bup"], ops["wconv"],
      ops["econv"], ops["bconv"], ops["p2t"], ops["wdn"], ops["bdn"],
      ops["gam"], ops["bet"])

    # ---- kernel 2: mergePooling + residual add, row-parallel over seq_len
    merge = _make_merge_kernel(seq_len, n_total, row_tile)
    out = pl.pallas_call(
        merge,
        out_shape=jax.ShapeDtypeStruct((1, seq_len, c_in), jnp.float32),
        grid_spec=pltpu.PrefetchScalarGridSpec(
            num_scalar_prefetch=0,
            grid=(ksteps,),
            in_specs=[
                pl.BlockSpec((None, row_tile, c_in), lambda i: (0, i, 0)),
                pl.BlockSpec((n_total, c_in), lambda i: (0, 0)),
            ],
            out_specs=pl.BlockSpec((None, row_tile, c_in), lambda i: (0, i, 0)),
        ),
        compiler_params=pltpu.CompilerParams(
            dimension_semantics=("parallel",)),
    )(seq, down)

    return out


# ------------------------- pure-JAX reference (check) -----------------------

def reference_forward(seq, params, shot_num, shot_channel):
    _, seq_len, c_in = seq.shape
    x = seq[0]
    y = x @ params["W_up"].T + params["b_up"]                  # [seq_len, C_shot]
    branch_n = [shot_num, int(shot_num * 1.5), int(shot_num * 0.5)]

    outs = []
    for b, nk in enumerate(branch_n):
        rows = []
        for i in range(nk):
            lo = (i * seq_len) // nk
            hi = -(-((i + 1) * seq_len) // nk)
            rows.append(y[lo:hi].mean(axis=0))
        s = jnp.stack(rows, 0)                                  # [nk, C_shot]

        conv_outs = []
        for c, (kk, d) in enumerate(CONV_CFG):
            w = params["conv_w"][b][c]
            bb = params["conv_b"][b][c]
            Lo = (shot_channel - d * (kk - 1) - 1) // STRIDE + 1
            cols = []
            for l in range(Lo):
                taps = jnp.stack([s[:, STRIDE * l + t * d] for t in range(kk)],
                                 axis=1)                        # [nk, kk]
                cols.append(jnp.einsum("oik,ik->o", w, taps) + bb)
            conv_outs.append(jnp.maximum(jnp.stack(cols, axis=1), 0.0))
        cat = jnp.concatenate(conv_outs, axis=1)                # [nk, L_total]

        Lt = cat.shape[1]
        pc = []
        for i in range(shot_channel):
            lo = (i * Lt) // shot_channel
            hi = -(-((i + 1) * Lt) // shot_channel)
            pc.append(cat[:, lo:hi].mean(axis=1))
        pooled = jnp.stack(pc, axis=1)                          # [nk, C_shot]

        h = jnp.maximum(pooled @ params["W_down"][b].T + params["b_down"][b], 0.0)
        mu = h.mean(-1, keepdims=True)
        var = ((h - mu) ** 2).mean(-1, keepdims=True)
        d_k = (h - mu) / jnp.sqrt(var + 1e-5) * params["ln_gamma"][b] \
            + params["ln_beta"][b]
        outs.append(d_k)

    down = jnp.concatenate(outs, 0)                             # [n_total, C_in]
    n_total = down.shape[0]
    split = seq_len // n_total
    idx = np.minimum(np.arange(seq_len) // split, n_total - 1)
    return (x + down[idx])[None]


# ---------------------------------- main ------------------------------------

if __name__ == "__main__":
    # small, module-consistent shapes
    shot_num = 4
    shot_channel = 64
    input_channel = 32
    seq_len = 50            # exercises the ragged last tile + merge remainder

    branch_n = [shot_num, int(shot_num * 1.5), int(shot_num * 0.5)]

    def uinit(k, shape, fan_in):
        b = 1.0 / np.sqrt(fan_in)
        return jax.random.uniform(k, shape, jnp.float32, -b, b)

    keys = iter(jax.random.split(jax.random.PRNGKey(0), 64))
    params = {
        "W_up": uinit(next(keys), (shot_channel, input_channel), input_channel),
        "b_up": uinit(next(keys), (shot_channel,), input_channel),
        "conv_w": [], "conv_b": [],
        "W_down": [], "b_down": [], "ln_gamma": [], "ln_beta": [],
    }
    for nk in branch_n:
        ws, bs = [], []
        for kk, _ in CONV_CFG:
            ws.append(uinit(next(keys), (nk, nk, kk), nk * kk))
            bs.append(uinit(next(keys), (nk,), nk * kk))
        params["conv_w"].append(ws)
        params["conv_b"].append(bs)
        params["W_down"].append(uinit(next(keys), (input_channel, shot_channel),
                                      shot_channel))
        params["b_down"].append(uinit(next(keys), (input_channel,), shot_channel))
        params["ln_gamma"].append(jnp.ones((input_channel,), jnp.float32))
        params["ln_beta"].append(jnp.zeros((input_channel,), jnp.float32))

    seq = jax.random.normal(next(keys), (1, seq_len, input_channel), jnp.float32)

    ops, meta = pack_operands(params, shot_num, shot_channel, input_channel)
    out = shot_level_extraction_forward(seq, ops, meta, shot_num, shot_channel)
    out = jax.block_until_ready(out)

    ref = jax.block_until_ready(
        reference_forward(seq, params, shot_num, shot_channel))
    np.testing.assert_allclose(np.asarray(out), np.asarray(ref),
                               rtol=5e-4, atol=5e-4)

    print("KERNEL_OK")
</pallas_src>

<mosaic_0001>
module attributes {stable_mosaic.version = 11 : i64} {
  func.func @kernel(%arg0: i32, %arg1: memref<12x1xi32, #tpu.memory_space<vmem>>, %arg2: memref<12x1xi32, #tpu.memory_space<vmem>>, %arg3: memref<12x1xf32, #tpu.memory_space<vmem>>, %arg4: memref<1x128x32xf32, #tpu.memory_space<vmem>>, %arg5: memref<32x64xf32, #tpu.memory_space<vmem>>, %arg6: memref<1x64xf32, #tpu.memory_space<vmem>>, %arg7: memref<10x12x12xf32, #tpu.memory_space<vmem>>, %arg8: memref<10x64x64xf32, #tpu.memory_space<vmem>>, %arg9: memref<12x64xf32, #tpu.memory_space<vmem>>, %arg10: memref<64x64xf32, #tpu.memory_space<vmem>>, %arg11: memref<192x32xf32, #tpu.memory_space<vmem>>, %arg12: memref<12x32xf32, #tpu.memory_space<vmem>>, %arg13: memref<12x32xf32, #tpu.memory_space<vmem>>, %arg14: memref<12x32xf32, #tpu.memory_space<vmem>>, %arg15: memref<12x32xf32, #tpu.memory_space<vmem>>, %arg16: memref<12x32xf32, #tpu.memory_space<vmem>>) attributes {dimension_semantics = [#tpu.dimension_semantics<arbitrary>], iteration_bounds = array<i64: 1>, scalar_prefetch = 0 : i64, scratch_operands = 1 : i64, tpu.core_type = #tpu.core_type<tc>, window_params = [{pipeline_mode = #tpu.pipeline_mode<synchronous>, transform_indices = @transform_0, window_bounds = array<i64: 12, 1>}, {pipeline_mode = #tpu.pipeline_mode<synchronous>, transform_indices = @transform_1, window_bounds = array<i64: 12, 1>}, {pipeline_mode = #tpu.pipeline_mode<synchronous>, transform_indices = @transform_2, window_bounds = array<i64: 12, 1>}, {transform_indices = @transform_3, window_bounds = array<i64: 1, 128, 32>}, {pipeline_mode = #tpu.pipeline_mode<synchronous>, transform_indices = @transform_4, window_bounds = array<i64: 32, 64>}, {pipeline_mode = #tpu.pipeline_mode<synchronous>, transform_indices = @transform_5, window_bounds = array<i64: 1, 64>}, {pipeline_mode = #tpu.pipeline_mode<synchronous>, transform_indices = @transform_6, window_bounds = array<i64: 10, 12, 12>}, {pipeline_mode = #tpu.pipeline_mode<synchronous>, transform_indices = @transform_7, window_bounds = array<i64: 10, 64, 64>}, {pipeline_mode = #tpu.pipeline_mode<synchronous>, transform_indices = @transform_8, window_bounds = array<i64: 12, 64>}, {pipeline_mode = #tpu.pipeline_mode<synchronous>, transform_indices = @transform_9, window_bounds = array<i64: 64, 64>}, {pipeline_mode = #tpu.pipeline_mode<synchronous>, transform_indices = @transform_10, window_bounds = array<i64: 192, 32>}, {pipeline_mode = #tpu.pipeline_mode<synchronous>, transform_indices = @transform_11, window_bounds = array<i64: 12, 32>}, {pipeline_mode = #tpu.pipeline_mode<synchronous>, transform_indices = @transform_12, window_bounds = array<i64: 12, 32>}, {pipeline_mode = #tpu.pipeline_mode<synchronous>, transform_indices = @transform_13, window_bounds = array<i64: 12, 32>}, {pipeline_mode = #tpu.pipeline_mode<synchronous>, transform_indices = @transform_14, window_bounds = array<i64: 12, 32>}]} {
    %c0_i32 = arith.constant 0 : i32
    %0 = arith.cmpi eq, %arg0, %c0_i32 : i32
    %1 = arith.extui %0 : i1 to i32
    %c0_i32_0 = arith.constant 0 : i32
    %2 = arith.cmpi ne, %1, %c0_i32_0 : i32
    scf.if %2 {
      %cst_18 = arith.constant 0.000000e+00 : f32
      %36 = vector.broadcast %cst_18 : f32 to vector<12x32xf32>
      %c0_19 = arith.constant 0 : index
      %c0_20 = arith.constant 0 : index
      %37 = vector.load %arg16[%c0_19, %c0_20] : memref<12x32xf32, #tpu.memory_space<vmem>>, vector<12x32xf32>
      tpu.vector_store %arg16[%c0_19, %c0_20], %36 {strides = array<i32>} : memref<12x32xf32, #tpu.memory_space<vmem>>, vector<12x32xf32>,
    } else {
    }
    %c128_i32 = arith.constant 128 : i32
    %3 = arith.muli %arg0, %c128_i32 : i32
    %4 = tpu.iota {dimensions = array<i32: 1>} : vector<12x128xi32>
    %5 = vector.broadcast %3 : i32 to vector<12x128xi32>
    %6 = arith.addi %5, %4 : vector<12x128xi32>
    %c0 = arith.constant 0 : index
    %c0_1 = arith.constant 0 : index
    %7 = vector.load %arg1[%c0, %c0_1] : memref<12x1xi32, #tpu.memory_space<vmem>>, vector<12x1xi32>
    %8 = vector.broadcast %7 : vector<12x1xi32> to vector<12x128xi32>
    %9 = arith.cmpi sge, %6, %8 : vector<12x128xi32>
    %c0_2 = arith.constant 0 : index
    %c0_3 = arith.constant 0 : index
    %10 = vector.load %arg2[%c0_2, %c0_3] : memref<12x1xi32, #tpu.memory_space<vmem>>, vector<12x1xi32>
    %11 = vector.broadcast %10 : vector<12x1xi32> to vector<12x128xi32>
    %12 = arith.cmpi slt, %6, %11 : vector<12x128xi32>
    %13 = arith.andi %9, %12 : vector<12x128xi1>
    %c0_4 = arith.constant 0 : index
    %c0_5 = arith.constant 0 : index
    %14 = vector.load %arg3[%c0_4, %c0_5] : memref<12x1xf32, #tpu.memory_space<vmem>>, vector<12x1xf32>
    %cst = arith.constant 0.000000e+00 : f32
    %15 = vector.shape_cast %14 : vector<12x1xf32> to vector<12x1xf32>
    %16 = vector.broadcast %15 : vector<12x1xf32> to vector<12x128xf32>
    %17 = vector.broadcast %cst : f32 to vector<12x128xf32>
    %18 = arith.select %13, %16, %17 : vector<12x128xi1>, vector<12x128xf32>
    %c128_i32_6 = arith.constant 128 : i32
    %19 = arith.muli %arg0, %c128_i32_6 : i32
    %20 = tpu.iota {dimensions = array<i32: 0>} : vector<128x32xi32>
    %21 = vector.broadcast %19 : i32 to vector<128x32xi32>
    %22 = arith.addi %21, %20 : vector<128x32xi32>
    %c50_i32 = arith.constant 50 : i32
    %23 = vector.broadcast %c50_i32 : i32 to vector<128x32xi32>
    %24 = arith.cmpi slt, %22, %23 : vector<128x32xi32>
    %c0_7 = arith.constant 0 : index
    %c0_8 = arith.constant 0 : index
    %c0_9 = arith.constant 0 : index
    %25 = vector.load %arg4[%c0_7, %c0_8, %c0_9] : memref<1x128x32xf32, #tpu.memory_space<vmem>>, vector<1x128x32xf32>
    %26 = vector.shape_cast %25 : vector<1x128x32xf32> to vector<128x32xf32>
    %cst_10 = arith.constant 0.000000e+00 : f32
    %27 = vector.broadcast %cst_10 : f32 to vector<128x32xf32>
    %28 = arith.select %24, %26, %27 : vector<128x32xi1>, vector<128x32xf32>
    %c0_11 = arith.constant 0 : index
    %c0_12 = arith.constant 0 : index
    %29 = vector.load %arg16[%c0_11, %c0_12] : memref<12x32xf32, #tpu.memory_space<vmem>>, vector<12x32xf32>
    %cst_13 = arith.constant dense<0.000000e+00> : vector<12x32xf32>
    %30 = tpu.matmul %18, %28, %cst_13 {dimension_numbers = #tpu.dot_dimension_numbers<[1], [0], [0], [1], [0, 0, 1, 1], [], []>} : vector<12x128xf32>, vector<128x32xf32>, vector<12x32xf32> -> vector<12x32xf32>
    %31 = arith.addf %29, %30 : vector<12x32xf32>
    %c0_14 = arith.constant 0 : index
    %c0_15 = arith.constant 0 : index
    %32 = vector.load %arg16[%c0_14, %c0_15] : memref<12x32xf32, #tpu.memory_space<vmem>>, vector<12x32xf32>
    tpu.vector_store %arg16[%c0_14, %c0_15], %31 {strides = array<i32>} : memref<12x32xf32, #tpu.memory_space<vmem>>, vector<12x32xf32>,
    %c0_i32_16 = arith.constant 0 : i32
    %33 = arith.cmpi eq, %arg0, %c0_i32_16 : i32
    %34 = arith.extui %33 : i1 to i32
    %c0_i32_17 = arith.constant 0 : i32
    %35 = arith.cmpi ne, %34, %c0_i32_17 : i32
    scf.if %35 {
      %c0_18 = arith.constant 0 : index
      %c0_19 = arith.constant 0 : index
      %36 = vector.load %arg16[%c0_18, %c0_19] : memref<12x32xf32, #tpu.memory_space<vmem>>, vector<12x32xf32>
      %c0_20 = arith.constant 0 : index
      %c0_21 = arith.constant 0 : index
      %37 = vector.load %arg5[%c0_20, %c0_21] : memref<32x64xf32, #tpu.memory_space<vmem>>, vector<32x64xf32>
      %cst_22 = arith.constant dense<0.000000e+00> : vector<12x64xf32>
      %38 = tpu.matmul %36, %37, %cst_22 {dimension_numbers = #tpu.dot_dimension_numbers<[1], [0], [0], [1], [0, 0, 1, 1], [], []>} : vector<12x32xf32>, vector<32x64xf32>, vector<12x64xf32> -> vector<12x64xf32>
      %c0_23 = arith.constant 0 : index
      %c0_24 = arith.constant 0 : index
      %39 = vector.load %arg6[%c0_23, %c0_24] : memref<1x64xf32, #tpu.memory_space<vmem>>, vector<1x64xf32>
      %40 = vector.broadcast %39 : vector<1x64xf32> to vector<12x64xf32>
      %41 = arith.addf %38, %40 : vector<12x64xf32>
      %c0_25 = arith.constant 0 : index
      %c0_26 = arith.constant 0 : index
      %42 = vector.load %arg9[%c0_25, %c0_26] : memref<12x64xf32, #tpu.memory_space<vmem>>, vector<12x64xf32>
      %c0_27 = arith.constant 0 : index
      %c0_28 = arith.constant 0 : index
      %c0_29 = arith.constant 0 : index
      %43 = vector.load %arg7[%c0_27, %c0_28, %c0_29] : memref<10x12x12xf32, #tpu.memory_space<vmem>>, vector<1x12x12xf32>
      %44 = vector.shape_cast %43 : vector<1x12x12xf32> to vector<12x12xf32>
      %cst_30 = arith.constant dense<0.000000e+00> : vector<12x64xf32>
      %45 = tpu.matmul %44, %41, %cst_30 {dimension_numbers = #tpu.dot_dimension_numbers<[1], [0], [0], [1], [0, 0, 1, 1], [], []>} : vector<12x12xf32>, vector<12x64xf32>, vector<12x64xf32> -> vector<12x64xf32>
      %c0_31 = arith.constant 0 : index
      %c0_32 = arith.constant 0 : index
      %c0_33 = arith.constant 0 : index
      %46 = vector.load %arg8[%c0_31, %c0_32, %c0_33] : memref<10x64x64xf32, #tpu.memory_space<vmem>>, vector<1x64x64xf32>
      %47 = vector.shape_cast %46 : vector<1x64x64xf32> to vector<64x64xf32>
      %cst_34 = arith.constant dense<0.000000e+00> : vector<12x64xf32>
      %48 = tpu.matmul %45, %47, %cst_34 {dimension_numbers = #tpu.dot_dimension_numbers<[1], [0], [0], [1], [0, 0, 1, 1], [], []>} : vector<12x64xf32>, vector<64x64xf32>, vector<12x64xf32> -> vector<12x64xf32>
      %49 = arith.addf %42, %48 : vector<12x64xf32>
      %c1 = arith.constant 1 : index
      %c0_35 = arith.constant 0 : index
      %c0_36 = arith.constant 0 : index
      %50 = vector.load %arg7[%c1, %c0_35, %c0_36] : memref<10x12x12xf32, #tpu.memory_space<vmem>>, vector<1x12x12xf32>
      %51 = vector.shape_cast %50 : vector<1x12x12xf32> to vector<12x12xf32>
      %cst_37 = arith.constant dense<0.000000e+00> : vector<12x64xf32>
      %52 = tpu.matmul %51, %41, %cst_37 {dimension_numbers = #tpu.dot_dimension_numbers<[1], [0], [0], [1], [0, 0, 1, 1], [], []>} : vector<12x12xf32>, vector<12x64xf32>, vector<12x64xf32> -> vector<12x64xf32>
      %c1_38 = arith.constant 1 : index
      %c0_39 = arith.constant 0 : index
      %c0_40 = arith.constant 0 : index
      %53 = vector.load %arg8[%c1_38, %c0_39, %c0_40] : memref<10x64x64xf32, #tpu.memory_space<vmem>>, vector<1x64x64xf32>
      %54 = vector.shape_cast %53 : vector<1x64x64xf32> to vector<64x64xf32>
      %cst_41 = arith.constant dense<0.000000e+00> : vector<12x64xf32>
      %55 = tpu.matmul %52, %54, %cst_41 {dimension_numbers = #tpu.dot_dimension_numbers<[1], [0], [0], [1], [0, 0, 1, 1], [], []>} : vector<12x64xf32>, vector<64x64xf32>, vector<12x64xf32> -> vector<12x64xf32>
      %56 = arith.addf %49, %55 : vector<12x64xf32>
      %c2 = arith.constant 2 : index
      %c0_42 = arith.constant 0 : index
      %c0_43 = arith.constant 0 : index
      %57 = vector.load %arg7[%c2, %c0_42, %c0_43] : memref<10x12x12xf32, #tpu.memory_space<vmem>>, vector<1x12x12xf32>
      %58 = vector.shape_cast %57 : vector<1x12x12xf32> to vector<12x12xf32>
      %cst_44 = arith.constant dense<0.000000e+00> : vector<12x64xf32>
      %59 = tpu.matmul %58, %41, %cst_44 {dimension_numbers = #tpu.dot_dimension_numbers<[1], [0], [0], [1], [0, 0, 1, 1], [], []>} : vector<12x12xf32>, vector<12x64xf32>, vector<12x64xf32> -> vector<12x64xf32>
      %c2_45 = arith.constant 2 : index
      %c0_46 = arith.constant 0 : index
      %c0_47 = arith.constant 0 : index
      %60 = vector.load %arg8[%c2_45, %c0_46, %c0_47] : memref<10x64x64xf32, #tpu.memory_space<vmem>>, vector<1x64x64xf32>
      %61 = vector.shape_cast %60 : vector<1x64x64xf32> to vector<64x64xf32>
      %cst_48 = arith.constant dense<0.000000e+00> : vector<12x64xf32>
      %62 = tpu.matmul %59, %61, %cst_48 {dimension_numbers = #tpu.dot_dimension_numbers<[1], [0], [0], [1], [0, 0, 1, 1], [], []>} : vector<12x64xf32>, vector<64x64xf32>, vector<12x64xf32> -> vector<12x64xf32>
      %63 = arith.addf %56, %62 : vector<12x64xf32>
      %c3 = arith.constant 3 : index
      %c0_49 = arith.constant 0 : index
      %c0_50 = arith.constant 0 : index
      %64 = vector.load %arg7[%c3, %c0_49, %c0_50] : memref<10x12x12xf32, #tpu.memory_space<vmem>>, vector<1x12x12xf32>
      %65 = vector.shape_cast %64 : vector<1x12x12xf32> to vector<12x12xf32>
      %cst_51 = arith.constant dense<0.000000e+00> : vector<12x64xf32>
      %66 = tpu.matmul %65, %41, %cst_51 {dimension_numbers = #tpu.dot_dimension_numbers<[1], [0], [0], [1], [0, 0, 1, 1], [], []>} : vector<12x12xf32>, vector<12x64xf32>, vector<12x64xf32> -> vector<12x64xf32>
      %c3_52 = arith.constant 3 : index
      %c0_53 = arith.constant 0 : index
      %c0_54 = arith.constant 0 : index
      %67 = vector.load %arg8[%c3_52, %c0_53, %c0_54] : memref<10x64x64xf32, #tpu.memory_space<vmem>>, vector<1x64x64xf32>
      %68 = vector.shape_cast %67 : vector<1x64x64xf32> to vector<64x64xf32>
      %cst_55 = arith.constant dense<0.000000e+00> : vector<12x64xf32>
      %69 = tpu.matmul %66, %68, %cst_55 {dimension_numbers = #tpu.dot_dimension_numbers<[1], [0], [0], [1], [0, 0, 1, 1], [], []>} : vector<12x64xf32>, vector<64x64xf32>, vector<12x64xf32> -> vector<12x64xf32>
      %70 = arith.addf %63, %69 : vector<12x64xf32>
      %c4 = arith.constant 4 : index
      %c0_56 = arith.constant 0 : index
      %c0_57 = arith.constant 0 : index
      %71 = vector.load %arg7[%c4, %c0_56, %c0_57] : memref<10x12x12xf32, #tpu.memory_space<vmem>>, vector<1x12x12xf32>
      %72 = vector.shape_cast %71 : vector<1x12x12xf32> to vector<12x12xf32>
      %cst_58 = arith.constant dense<0.000000e+00> : vector<12x64xf32>
      %73 = tpu.matmul %72, %41, %cst_58 {dimension_numbers = #tpu.dot_dimension_numbers<[1], [0], [0], [1], [0, 0, 1, 1], [], []>} : vector<12x12xf32>, vector<12x64xf32>, vector<12x64xf32> -> vector<12x64xf32>
      %c4_59 = arith.constant 4 : index
      %c0_60 = arith.constant 0 : index
      %c0_61 = arith.constant 0 : index
      %74 = vector.load %arg8[%c4_59, %c0_60, %c0_61] : memref<10x64x64xf32, #tpu.memory_space<vmem>>, vector<1x64x64xf32>
      %75 = vector.shape_cast %74 : vector<1x64x64xf32> to vector<64x64xf32>
      %cst_62 = arith.constant dense<0.000000e+00> : vector<12x64xf32>
      %76 = tpu.matmul %73, %75, %cst_62 {dimension_numbers = #tpu.dot_dimension_numbers<[1], [0], [0], [1], [0, 0, 1, 1], [], []>} : vector<12x64xf32>, vector<64x64xf32>, vector<12x64xf32> -> vector<12x64xf32>
      %77 = arith.addf %70, %76 : vector<12x64xf32>
      %c5 = arith.constant 5 : index
      %c0_63 = arith.constant 0 : index
      %c0_64 = arith.constant 0 : index
      %78 = vector.load %arg7[%c5, %c0_63, %c0_64] : memref<10x12x12xf32, #tpu.memory_space<vmem>>, vector<1x12x12xf32>
      %79 = vector.shape_cast %78 : vector<1x12x12xf32> to vector<12x12xf32>
      %cst_65 = arith.constant dense<0.000000e+00> : vector<12x64xf32>
      %80 = tpu.matmul %79, %41, %cst_65 {dimension_numbers = #tpu.dot_dimension_numbers<[1], [0], [0], [1], [0, 0, 1, 1], [], []>} : vector<12x12xf32>, vector<12x64xf32>, vector<12x64xf32> -> vector<12x64xf32>
      %c5_66 = arith.constant 5 : index
      %c0_67 = arith.constant 0 : index
      %c0_68 = arith.constant 0 : index
      %81 = vector.load %arg8[%c5_66, %c0_67, %c0_68] : memref<10x64x64xf32, #tpu.memory_space<vmem>>, vector<1x64x64xf32>
      %82 = vector.shape_cast %81 : vector<1x64x64xf32> to vector<64x64xf32>
      %cst_69 = arith.constant dense<0.000000e+00> : vector<12x64xf32>
      %83 = tpu.matmul %80, %82, %cst_69 {dimension_numbers = #tpu.dot_dimension_numbers<[1], [0], [0], [1], [0, 0, 1, 1], [], []>} : vector<12x64xf32>, vector<64x64xf32>, vector<12x64xf32> -> vector<12x64xf32>
      %84 = arith.addf %77, %83 : vector<12x64xf32>
      %c6 = arith.constant 6 : index
      %c0_70 = arith.constant 0 : index
      %c0_71 = arith.constant 0 : index
      %85 = vector.load %arg7[%c6, %c0_70, %c0_71] : memref<10x12x12xf32, #tpu.memory_space<vmem>>, vector<1x12x12xf32>
      %86 = vector.shape_cast %85 : vector<1x12x12xf32> to vector<12x12xf32>
      %cst_72 = arith.constant dense<0.000000e+00> : vector<12x64xf32>
      %87 = tpu.matmul %86, %41, %cst_72 {dimension_numbers = #tpu.dot_dimension_numbers<[1], [0], [0], [1], [0, 0, 1, 1], [], []>} : vector<12x12xf32>, vector<12x64xf32>, vector<12x64xf32> -> vector<12x64xf32>
      %c6_73 = arith.constant 6 : index
      %c0_74 = arith.constant 0 : index
      %c0_75 = arith.constant 0 : index
      %88 = vector.load %arg8[%c6_73, %c0_74, %c0_75] : memref<10x64x64xf32, #tpu.memory_space<vmem>>, vector<1x64x64xf32>
      %89 = vector.shape_cast %88 : vector<1x64x64xf32> to vector<64x64xf32>
      %cst_76 = arith.constant dense<0.000000e+00> : vector<12x64xf32>
      %90 = tpu.matmul %87, %89, %cst_76 {dimension_numbers = #tpu.dot_dimension_numbers<[1], [0], [0], [1], [0, 0, 1, 1], [], []>} : vector<12x64xf32>, vector<64x64xf32>, vector<12x64xf32> -> vector<12x64xf32>
      %91 = arith.addf %84, %90 : vector<12x64xf32>
      %c7 = arith.constant 7 : index
      %c0_77 = arith.constant 0 : index
      %c0_78 = arith.constant 0 : index
      %92 = vector.load %arg7[%c7, %c0_77, %c0_78] : memref<10x12x12xf32, #tpu.memory_space<vmem>>, vector<1x12x12xf32>
      %93 = vector.shape_cast %92 : vector<1x12x12xf32> to vector<12x12xf32>
      %cst_79 = arith.constant dense<0.000000e+00> : vector<12x64xf32>
      %94 = tpu.matmul %93, %41, %cst_79 {dimension_numbers = #tpu.dot_dimension_numbers<[1], [0], [0], [1], [0, 0, 1, 1], [], []>} : vector<12x12xf32>, vector<12x64xf32>, vector<12x64xf32> -> vector<12x64xf32>
      %c7_80 = arith.constant 7 : index
      %c0_81 = arith.constant 0 : index
      %c0_82 = arith.constant 0 : index
      %95 = vector.load %arg8[%c7_80, %c0_81, %c0_82] : memref<10x64x64xf32, #tpu.memory_space<vmem>>, vector<1x64x64xf32>
      %96 = vector.shape_cast %95 : vector<1x64x64xf32> to vector<64x64xf32>
      %cst_83 = arith.constant dense<0.000000e+00> : vector<12x64xf32>
      %97 = tpu.matmul %94, %96, %cst_83 {dimension_numbers = #tpu.dot_dimension_numbers<[1], [0], [0], [1], [0, 0, 1, 1], [], []>} : vector<12x64xf32>, vector<64x64xf32>, vector<12x64xf32> -> vector<12x64xf32>
      %98 = arith.addf %91, %97 : vector<12x64xf32>
      %c8 = arith.constant 8 : index
      %c0_84 = arith.constant 0 : index
      %c0_85 = arith.constant 0 : index
      %99 = vector.load %arg7[%c8, %c0_84, %c0_85] : memref<10x12x12xf32, #tpu.memory_space<vmem>>, vector<1x12x12xf32>
      %100 = vector.shape_cast %99 : vector<1x12x12xf32> to vector<12x12xf32>
      %cst_86 = arith.constant dense<0.000000e+00> : vector<12x64xf32>
      %101 = tpu.matmul %100, %41, %cst_86 {dimension_numbers = #tpu.dot_dimension_numbers<[1], [0], [0], [1], [0, 0, 1, 1], [], []>} : vector<12x12xf32>, vector<12x64xf32>, vector<12x64xf32> -> vector<12x64xf32>
      %c8_87 = arith.constant 8 : index
      %c0_88 = arith.constant 0 : index
      %c0_89 = arith.constant 0 : index
      %102 = vector.load %arg8[%c8_87, %c0_88, %c0_89] : memref<10x64x64xf32, #tpu.memory_space<vmem>>, vector<1x64x64xf32>
      %103 = vector.shape_cast %102 : vector<1x64x64xf32> to vector<64x64xf32>
      %cst_90 = arith.constant dense<0.000000e+00> : vector<12x64xf32>
      %104 = tpu.matmul %101, %103, %cst_90 {dimension_numbers = #tpu.dot_dimension_numbers<[1], [0], [0], [1], [0, 0, 1, 1], [], []>} : vector<12x64xf32>, vector<64x64xf32>, vector<12x64xf32> -> vector<12x64xf32>
      %105 = arith.addf %98, %104 : vector<12x64xf32>
      %c9 = arith.constant 9 : index
      %c0_91 = arith.constant 0 : index
      %c0_92 = arith.constant 0 : index
      %106 = vector.load %arg7[%c9, %c0_91, %c0_92] : memref<10x12x12xf32, #tpu.memory_space<vmem>>, vector<1x12x12xf32>
      %107 = vector.shape_cast %106 : vector<1x12x12xf32> to vector<12x12xf32>
      %cst_93 = arith.constant dense<0.000000e+00> : vector<12x64xf32>
      %108 = tpu.matmul %107, %41, %cst_93 {dimension_numbers = #tpu.dot_dimension_numbers<[1], [0], [0], [1], [0, 0, 1, 1], [], []>} : vector<12x12xf32>, vector<12x64xf32>, vector<12x64xf32> -> vector<12x64xf32>
      %c9_94 = arith.constant 9 : index
      %c0_95 = arith.constant 0 : index
      %c0_96 = arith.constant 0 : index
      %109 = vector.load %arg8[%c9_94, %c0_95, %c0_96] : memref<10x64x64xf32, #tpu.memory_space<vmem>>, vector<1x64x64xf32>
      %110 = vector.shape_cast %109 : vector<1x64x64xf32> to vector<64x64xf32>
      %cst_97 = arith.constant dense<0.000000e+00> : vector<12x64xf32>
      %111 = tpu.matmul %108, %110, %cst_97 {dimension_numbers = #tpu.dot_dimension_numbers<[1], [0], [0], [1], [0, 0, 1, 1], [], []>} : vector<12x64xf32>, vector<64x64xf32>, vector<12x64xf32> -> vector<12x64xf32>
      %112 = arith.addf %105, %111 : vector<12x64xf32>
      %cst_98 = arith.constant 0.000000e+00 : f32
      %113 = vector.broadcast %cst_98 : f32 to vector<12x64xf32>
      %114 = arith.maximumf %112, %113 : vector<12x64xf32>
      %c0_99 = arith.constant 0 : index
      %c0_100 = arith.constant 0 : index
      %115 = vector.load %arg10[%c0_99, %c0_100] : memref<64x64xf32, #tpu.memory_space<vmem>>, vector<64x64xf32>
      %cst_101 = arith.constant dense<0.000000e+00> : vector<12x64xf32>
      %116 = tpu.matmul %114, %115, %cst_101 {dimension_numbers = #tpu.dot_dimension_numbers<[1], [0], [0], [1], [0, 0, 1, 1], [], []>} : vector<12x64xf32>, vector<64x64xf32>, vector<12x64xf32> -> vector<12x64xf32>
      %117 = tpu.iota {dimensions = array<i32: 0>} : vector<12x64xi32>
      %c4_i32 = arith.constant 4 : i32
      %118 = vector.broadcast %c4_i32 : i32 to vector<12x64xi32>
      %119 = arith.cmpi slt, %117, %118 : vector<12x64xi32>
      %120 = arith.extui %119 : vector<12x64xi1> to vector<12x64xi32>
      %121 = arith.sitofp %120 : vector<12x64xi32> to vector<12x64xf32>
      %c4_i32_102 = arith.constant 4 : i32
      %122 = vector.broadcast %c4_i32_102 : i32 to vector<12x64xi32>
      %123 = arith.cmpi sge, %117, %122 : vector<12x64xi32>
      %c10_i32 = arith.constant 10 : i32
      %124 = vector.broadcast %c10_i32 : i32 to vector<12x64xi32>
      %125 = arith.cmpi slt, %117, %124 : vector<12x64xi32>
      %126 = arith.andi %123, %125 : vector<12x64xi1>
      %127 = arith.extui %126 : vector<12x64xi1> to vector<12x64xi32>
      %128 = arith.sitofp %127 : vector<12x64xi32> to vector<12x64xf32>
      %c10_i32_103 = arith.constant 10 : i32
      %129 = vector.broadcast %c10_i32_103 : i32 to vector<12x64xi32>
      %130 = arith.cmpi sge, %117, %129 : vector<12x64xi32>
      %131 = arith.extui %130 : vector<12x64xi1> to vector<12x64xi32>
      %132 = arith.sitofp %131 : vector<12x64xi32> to vector<12x64xf32>
      %133 = arith.mulf %116, %121 : vector<12x64xf32>
      %134 = arith.mulf %116, %128 : vector<12x64xf32>
      %135 = arith.mulf %116, %132 : vector<12x64xf32>
      %136 = tpu.concatenate %133, %134, %135 in 1 : vector<12x64xf32>, vector<12x64xf32>, vector<12x64xf32> -> vector<12x192xf32>
      %c0_104 = arith.constant 0 : index
      %c0_105 = arith.constant 0 : index
      %137 = vector.load %arg11[%c0_104, %c0_105] : memref<192x32xf32, #tpu.memory_space<vmem>>, vector<192x32xf32>
      %cst_106 = arith.constant dense<0.000000e+00> : vector<12x32xf32>
      %138 = tpu.matmul %136, %137, %cst_106 {dimension_numbers = #tpu.dot_dimension_numbers<[1], [0], [0], [1], [0, 0, 1, 1], [], []>} : vector<12x192xf32>, vector<192x32xf32>, vector<12x32xf32> -> vector<12x32xf32>
      %c0_107 = arith.constant 0 : index
      %c0_108 = arith.constant 0 : index
      %139 = vector.load %arg12[%c0_107, %c0_108] : memref<12x32xf32, #tpu.memory_space<vmem>>, vector<12x32xf32>
      %140 = arith.addf %138, %139 : vector<12x32xf32>
      %cst_109 = arith.constant 0.000000e+00 : f32
      %141 = vector.broadcast %cst_109 : f32 to vector<12x32xf32>
      %142 = arith.maximumf %140, %141 : vector<12x32xf32>
      %cst_110 = arith.constant dense<0.000000e+00> : vector<12xf32>
      %143 = vector.multi_reduction <add>, %142, %cst_110 [1] : vector<12x32xf32> to vector<12xf32>
      %144 = vector.shape_cast %143 : vector<12xf32> to vector<12x1xf32>
      %cst_111 = arith.constant 3.200000e+01 : f32
      %145 = vector.broadcast %cst_111 : f32 to vector<12x1xf32>
      %146 = arith.divf %144, %145 : vector<12x1xf32>
      %147 = vector.broadcast %146 : vector<12x1xf32> to vector<12x32xf32>
      %148 = arith.subf %142, %147 : vector<12x32xf32>
      %149 = arith.mulf %148, %148 : vector<12x32xf32>
      %cst_112 = arith.constant dense<0.000000e+00> : vector<12xf32>
      %150 = vector.multi_reduction <add>, %149, %cst_112 [1] : vector<12x32xf32> to vector<12xf32>
      %151 = vector.shape_cast %150 : vector<12xf32> to vector<12x1xf32>
      %cst_113 = arith.constant 3.200000e+01 : f32
      %152 = vector.broadcast %cst_113 : f32 to vector<12x1xf32>
      %153 = arith.divf %151, %152 : vector<12x1xf32>
      %cst_114 = arith.constant 9.99999974E-6 : f32
      %154 = vector.broadcast %cst_114 : f32 to vector<12x1xf32>
      %155 = arith.addf %153, %154 : vector<12x1xf32>
      %156 = math.rsqrt %155 : vector<12x1xf32>
      %157 = vector.broadcast %156 : vector<12x1xf32> to vector<12x32xf32>
      %158 = arith.mulf %148, %157 : vector<12x32xf32>
      %c0_115 = arith.constant 0 : index
      %c0_116 = arith.constant 0 : index
      %159 = vector.load %arg13[%c0_115, %c0_116] : memref<12x32xf32, #tpu.memory_space<vmem>>, vector<12x32xf32>
      %160 = arith.mulf %158, %159 : vector<12x32xf32>
      %c0_117 = arith.constant 0 : index
      %c0_118 = arith.constant 0 : index
      %161 = vector.load %arg14[%c0_117, %c0_118] : memref<12x32xf32, #tpu.memory_space<vmem>>, vector<12x32xf32>
      %162 = arith.addf %160, %161 : vector<12x32xf32>
      %c0_119 = arith.constant 0 : index
      %c0_120 = arith.constant 0 : index
      %163 = vector.load %arg15[%c0_119, %c0_120] : memref<12x32xf32, #tpu.memory_space<vmem>>, vector<12x32xf32>
      tpu.vector_store %arg15[%c0_119, %c0_120], %162 {strides = array<i32>} : memref<12x32xf32, #tpu.memory_space<vmem>>, vector<12x32xf32>,
    } else {
    }
    return
  }
  func.func @transform_0(%arg0: i32) -> (i32, i32) {
    %c0_i32 = arith.constant 0 : i32
    %c0_i32_0 = arith.constant 0 : i32
    %c0_i32_1 = arith.constant 0 : i32
    return %c0_i32, %c0_i32_0 : i32, i32
  }
  func.func @transform_1(%arg0: i32) -> (i32, i32) {
    %c0_i32 = arith.constant 0 : i32
    %c0_i32_0 = arith.constant 0 : i32
    %c0_i32_1 = arith.constant 0 : i32
    return %c0_i32, %c0_i32_0 : i32, i32
  }
  func.func @transform_2(%arg0: i32) -> (i32, i32) {
    %c0_i32 = arith.constant 0 : i32
    %c0_i32_0 = arith.constant 0 : i32
    %c0_i32_1 = arith.constant 0 : i32
    return %c0_i32, %c0_i32_0 : i32, i32
  }
  func.func @transform_3(%arg0: i32) -> (i32, i32, i32) {
    %c0_i32 = arith.constant 0 : i32
    %c0_i32_0 = arith.constant 0 : i32
    %c0_i32_1 = arith.constant 0 : i32
    return %c0_i32, %arg0, %c0_i32_0 : i32, i32, i32
  }
  func.func @transform_4(%arg0: i32) -> (i32, i32) {
    %c0_i32 = arith.constant 0 : i32
    %c0_i32_0 = arith.constant 0 : i32
    %c0_i32_1 = arith.constant 0 : i32
    return %c0_i32, %c0_i32_0 : i32, i32
  }
  func.func @transform_5(%arg0: i32) -> (i32, i32) {
    %c0_i32 = arith.constant 0 : i32
    %c0_i32_0 = arith.constant 0 : i32
    %c0_i32_1 = arith.constant 0 : i32
    return %c0_i32, %c0_i32_0 : i32, i32
  }
  func.func @transform_6(%arg0: i32) -> (i32, i32, i32) {
    %c0_i32 = arith.constant 0 : i32
    %c0_i32_0 = arith.constant 0 : i32
    %c0_i32_1 = arith.constant 0 : i32
    %c0_i32_2 = arith.constant 0 : i32
    return %c0_i32, %c0_i32_0, %c0_i32_1 : i32, i32, i32
  }
  func.func @transform_7(%arg0: i32) -> (i32, i32, i32) {
    %c0_i32 = arith.constant 0 : i32
    %c0_i32_0 = arith.constant 0 : i32
    %c0_i32_1 = arith.constant 0 : i32
    %c0_i32_2 = arith.constant 0 : i32
    return %c0_i32, %c0_i32_0, %c0_i32_1 : i32, i32, i32
  }
  func.func @transform_8(%arg0: i32) -> (i32, i32) {
    %c0_i32 = arith.constant 0 : i32
    %c0_i32_0 = arith.constant 0 : i32
    %c0_i32_1 = arith.constant 0 : i32
    return %c0_i32, %c0_i32_0 : i32, i32
  }
  func.func @transform_9(%arg0: i32) -> (i32, i32) {
    %c0_i32 = arith.constant 0 : i32
    %c0_i32_0 = arith.constant 0 : i32
    %c0_i32_1 = arith.constant 0 : i32
    return %c0_i32, %c0_i32_0 : i32, i32
  }
  func.func @transform_10(%arg0: i32) -> (i32, i32) {
    %c0_i32 = arith.constant 0 : i32
    %c0_i32_0 = arith.constant 0 : i32
    %c0_i32_1 = arith.constant 0 : i32
    return %c0_i32, %c0_i32_0 : i32, i32
  }
  func.func @transform_11(%arg0: i32) -> (i32, i32) {
    %c0_i32 = arith.constant 0 : i32
    %c0_i32_0 = arith.constant 0 : i32
    %c0_i32_1 = arith.constant 0 : i32
    return %c0_i32, %c0_i32_0 : i32, i32
  }
  func.func @transform_12(%arg0: i32) -> (i32, i32) {
    %c0_i32 = arith.constant 0 : i32
    %c0_i32_0 = arith.constant 0 : i32
    %c0_i32_1 = arith.constant 0 : i32
    return %c0_i32, %c0_i32_0 : i32, i32
  }
  func.func @transform_13(%arg0: i32) -> (i32, i32) {
    %c0_i32 = arith.constant 0 : i32
    %c0_i32_0 = arith.constant 0 : i32
    %c0_i32_1 = arith.constant 0 : i32
    return %c0_i32, %c0_i32_0 : i32, i32
  }
  func.func @transform_14(%arg0: i32) -> (i32, i32) {
    %c0_i32 = arith.constant 0 : i32
    %c0_i32_0 = arith.constant 0 : i32
    %c0_i32_1 = arith.constant 0 : i32
    return %c0_i32, %c0_i32_0 : i32, i32
  }
}

</mosaic_0001>

<bundles_post_ra>
// kernel: tpu_custom_call.1
= control target key start
LH: loop header
LB: loop body
LE: loop exit
PB: predicated region body
PF: predicated region fallthrough
CT: control target
= control target key end

     0   :  { %19 = vsyncpa [#allocation4], 0  ;;  %s1876_s0 = inlined_call_operand.vmem [shape: s32[12,1], index: 0, kind: input, shape index: {}]   ;;  %s1877_s1 = inlined_call_operand.vmem [shape: s32[12,1], index: 1, kind: input, shape index: {}]   ;;  %s1878_s2 = inlined_call_operand.vmem [shape: f32[12,1], index: 2, kind: input, shape index: {}]   ;;  %s1879_s3 = inlined_call_operand.vmem [shape: f32[1,50,32], index: 3, kind: input, shape index: {}]   ;;  %s1880_s4 = inlined_call_operand.vmem [shape: f32[32,64], index: 4, kind: input, shape index: {}]   ;;  %s1881_s5 = inlined_call_operand.vmem [shape: f32[1,64], index: 5, kind: input, shape index: {}]   ;;  %s1882_s6 = inlined_call_operand.vmem [shape: f32[10,12,12], index: 6, kind: input, shape index: {}]   ;;  %s1883_s7 = inlined_call_operand.hbm [shape: f32[10,64,64], index: 7, kind: input, shape index: {}]   ;;  %s1884_s8 = inlined_call_operand.vmem [shape: f32[12,64], index: 8, kind: input, shape index: {}]   ;;  %s1885_s9 = inlined_call_operand.vmem [shape: f32[64,64], index: 9, kind: input, shape index: {}]   ;;  %s1886_s10 = inlined_call_operand.vmem [shape: f32[192,32], index: 10, kind: input, shape index: {}]   ;;  %s1887_s11 = inlined_call_operand.vmem [shape: f32[12,32], index: 11, kind: input, shape index: {}]   ;;  %s1888_s12 = inlined_call_operand.hbm [shape: f32[12,32], index: 12, kind: input, shape index: {}]   ;;  %s1889_s13 = inlined_call_operand.hbm [shape: f32[12,32], index: 13, kind: input, shape index: {}]   ;;  %s1890_s14 = inlined_call_operand.hbm [shape: f32[12,32], index: 14, kind: output, shape index: {}]  }
   0x1   :  { %20 = vsyncpa [#allocation7], 0 }
   0x2   :  { %21 = vsyncpa [#allocation5], 0  ;;  %s61_s15 = sshll.u32 %s1888_s12, 4  ;;  %s1465_s16 = smov [#allocation6]   ;;  %s62_s15 = int_to_ptr.hbm [resolvable:$true] %s61_s15 }
   0x3   :  { %s63_s17 = sshll.u32 %s1465_s16, 4  ;;  %s40_s20 = sshll.u32 %s1883_s7, 4  ;;  %s64_s17 = int_to_ptr.vmem [resolvable:$true] %s63_s17  ;;  %s41_s20 = int_to_ptr.hbm [resolvable:$true] %s40_s20 }
   0x4   :  { %s1466_s21 = smov 128   ;;  %s1467_s22 = smov 8  }
   0x5   :  { %69 = dma.hbm_to_vmem [thread:$0]  %s62_s15, 256, %s64_s17, [#allocation7], %s1466_s21, %s1466_s21, %s1467_s22  }
   0x6   :  { %s1468_s23 = smov [#allocation3]   ;;  %s74_s12 = sshll.u32 %s1889_s13, 4  ;;  %s75_s12 = int_to_ptr.hbm [resolvable:$true] %s74_s12 }
   0x7   :  { %s42_s24 = sshll.u32 %s1468_s23, 4  ;;  %s1469_s7 = smov [#allocation8]   ;;  %s43_s24 = int_to_ptr.vmem [resolvable:$true] %s42_s24 }
   0x8   :  { %48 = dma.hbm_to_vmem [thread:$0]  %s41_s20, 10240, %s43_s24, [#allocation4], %s1466_s21, %s1466_s21, %s1467_s22  }
   0x9   :  { %s76_s27 = sshll.u32 %s1469_s7, 4  ;;  %s77_s27 = int_to_ptr.vmem [resolvable:$true] %s76_s27 }
   0xa   :  { %82 = dma.hbm_to_vmem [thread:$0]  %s75_s12, 256, %s77_s27, [#allocation7], %s1466_s21, %s1466_s21, %s1467_s22  }
   0xb   :  { %1459 = dma.done.wait [#allocation4], 10240  }
   0xc   :  { %1460 = vsyncadd [#allocation4], 4294957056 }
   0xd   :  { %1461 = dma.done.wait [#allocation7], 512  }
   0xe   :  { %1462 = vsyncadd [#allocation7], 4294966784  ;;  %v104_v0 = vlaneseq  ;;  %v1470_v1 = vmov 0   ;;  %v130_v4 = vld [vmem:[%s1878_s2] sm:$0xff]  ;;  %v119_v6 = vld [vmem:[%s1877_s1 + $0x8] sm:$0xf] }
   0xf   :  { %1354 = vset.pattern.permute.xlu1 %v1470_v1  ;;  %1353 = vset.pattern.permute.xlu0 %v1470_v1  ;;  %v108_v5 = vld [vmem:[%s1876_s0] sm:$0xff]  ;;  %v199_v7 = vld [vmem:[%s1879_s3 + $0x30] sm:$0xff]  ;;  %v198_v8 = vld [vmem:[%s1879_s3 + $0x28] sm:$0xff]  ;;  %vm99_vm1 = vcmask 261120   ;;  %v1471_v17 = vmov 0.0   ;;  %vm101_vm8 = vcmask 257024  }
  0x10   :  { %1355 = vset.pattern.permute.xlu2 %v1470_v1  ;;  %v1568_v2 = vshrl.u32 %v104_v0, 7  ;;  %134 = vperm.xlu1 %1354, %v130_v4   ;;  %v109_v9 = vld [vmem:[%s1876_s0 + $0x8] sm:$0xf]  ;;  %v118_v10 = vld [vmem:[%s1877_s1] sm:$0xff]  ;;  %v196_v13 = vld [vmem:[%s1879_s3 + $0x18] sm:$0xff]  ;;  %100 = vst.msk [vmem:[#allocation2] sm:$0xff] %vm99_vm1, %v1471_v17 }
  0x11   :  { %111 = vperm.xlu0 %1353, %v108_v5   ;;  %124 = vperm.xlu2 %1355, %v119_v6   ;;  %v131_v11 = vld [vmem:[%s1878_s2 + $0x8] sm:$0xf]  ;;  %v197_v12 = vld [vmem:[%s1879_s3 + $0x20] sm:$0xff]  ;;  %v195_v14 = vld [vmem:[%s1879_s3 + $0x10] sm:$0xff]  ;;  %v105_v20 = vand.u32 127, %v104_v0  ;;  %vm309_vm9 = vcmask 1043456  }
  0x12   :  { %v151_v3 = vadd.s32 48, %v1568_v2  ;;  %v194_v15 = vld [vmem:[%s1879_s3 + $0x8] sm:$0xff]  ;;  %v193_v16 = vld [vmem:[%s1879_s3] sm:$0xff]  ;;  %102 = vst.msk [vmem:[#allocation2 + $0x8] sm:$0xf] %vm101_vm8, %v1471_v17  ;;  %v264_v25 = vld [vmem:[%s1880_s4 + $0x18] sm:$0xff] }
  0x13   :  { %v263_v26 = vld [vmem:[%s1880_s4 + $0x10] sm:$0xff]  ;;  %287 = vmatpush.msra.mxu1 %v264_v25  ;;  %v262_v27 = vld [vmem:[%s1880_s4 + $0x8] sm:$0xff]  ;;  %v261_v28 = vld [vmem:[%s1880_s4] sm:$0xff]  ;;  %vm302_vm10 = vcmask 97280   ;;  %vm344_vm11 = vcmask 523264   ;;  %vm1069_vm12 = vcmp.ge.s32.totalorder %v1568_v2, 4 }
  0x14   :  { %vm183_vm0 = vcmp.lt.s32.totalorder %v151_v3, 50  ;;  %v1356_v38 = vld [vmem:[%s1881_s5] ss:$0 sm:$0xff]  ;;  %v301_v44 = vld [vmem:[%s1882_s6 + $0x8] sm:$0xf]  ;;  %v1272_v46 = vld [vmem:[%s1882_s6 + $0x10] sm:$0xff] }
  0x15   :  { %1262 = vmatpush.msk.msra.mxu0 %vm183_vm0, %v199_v7  ;;  %288 = vmatpush.msra.mxu1 %v263_v26  ;;  %v300_v42 = vld [vmem:[%s1882_s6] sm:$0xff]  ;;  %v1280_v45 = vld [vmem:[%s1882_s6 + $0x28] sm:$0xf]  ;;  %v1273_v48 = vld [vmem:[%s1882_s6 + $0x18] sm:$0xf]  ;;  %s1472_s13 = smov 64  }
  0x16   :  { %v1279_v43 = vld [vmem:[%s1882_s6 + $0x20] sm:$0xff]  ;;  %v1294_v49 = vld [vmem:[%s1882_s6 + $0x48] sm:$0xf]  ;;  %v1286_v50 = vld [vmem:[%s1882_s6 + $0x30] sm:$0xff]  ;;  %vm1063_vm15 = vcmp.lt.s32.totalorder %v1568_v2, 4 }
  0x17   :  { %237 = vmatpush.msra.mxu0 %v198_v8  ;;  %289 = vmatpush.msra.mxu1 %v262_v27  ;;  %v225_v29 = vld [vmem:[#allocation2] sm:$0xff]  ;;  %v1287_v52 = vld [vmem:[%s1882_s6 + $0x38] sm:$0xf]  ;;  %v1308_v53 = vld [vmem:[%s1882_s6 + $0x68] sm:$0xf] }
  0x18   :  { %114 = vperm.xlu1 %1354, %v109_v9   ;;  %v1293_v47 = vld [vmem:[%s1882_s6 + $0x40] sm:$0xff]  ;;  %v1300_v54 = vld [vmem:[%s1882_s6 + $0x50] sm:$0xff]  ;;  %v1301_v56 = vld [vmem:[%s1882_s6 + $0x58] sm:$0xf] }
  0x19   :  { %121 = vperm.xlu0 %1353, %v118_v10   ;;  %139 = vperm.xlu2 %1355, %v131_v11   ;;  %v226_v32 = vld [vmem:[#allocation2 + $0x8] sm:$0xf]  ;;  %v1307_v51 = vld [vmem:[%s1882_s6 + $0x60] sm:$0xff]  ;;  %v341_v60 = vld [vmem:[#allocation3 + $0x28] sm:$0xff] }
  0x1a   :  { %238 = vmatpush.msra.mxu0 %v197_v12  ;;  %290 = vmatpush.msra.mxu1 %v261_v28  ;;  %v1321_v55 = vld [vmem:[%s1882_s6 + $0x80] sm:$0xff]  ;;  %v1322_v57 = vld [vmem:[%s1882_s6 + $0x88] sm:$0xf]  ;;  %v340_v62 = vld [vmem:[#allocation3 + $0x20] sm:$0xff] }
  0x1b   :  { %v343_v58 = vld [vmem:[#allocation3 + $0x38] sm:$0xff]  ;;  %v342_v59 = vld [vmem:[#allocation3 + $0x30] sm:$0xff]  ;;  %v1314_v63 = vld [vmem:[%s1882_s6 + $0x70] sm:$0xff] }
  0x1c   :  { %239 = vmatpush.msra.mxu0 %v196_v13  ;;  %359 = vmatpush.msrb.mxu1 %v343_v58  ;;  %v488_v61 = vld [vmem:[#allocation3 + $0xb8] sm:$0xff]  ;;  %v338_v1 = vld [vmem:[#allocation3 + $0x10] sm:$0xff]  ;;  %v337_v3 = vld [vmem:[#allocation3 + $0x8] sm:$0xff] }
  0x1d   :  { %503 = vmatpush.msra.mxu3 %v488_v61  ;;  %v339_v0 = vld [vmem:[#allocation3 + $0x18] sm:$0xff]  ;;  %v336_v4 = vld [vmem:[#allocation3] sm:$0xff]  ;;  %v1315_v5 = vld [vmem:[%s1882_s6 + $0x78] sm:$0xf] }
  0x1e   :  { %240 = vmatpush.msra.mxu0 %v195_v14  ;;  %360 = vmatpush.msrb.mxu1 %v342_v59  ;;  %v1328_v6 = vld [vmem:[%s1882_s6 + $0x90] sm:$0xff]  ;;  %v1329_v7 = vld [vmem:[%s1882_s6 + $0x98] sm:$0xf]  ;;  %v487_v8 = vld [vmem:[#allocation3 + $0xb0] sm:$0xff] }
  0x1f   :  { %504 = vmatpush.msra.mxu3 %v487_v8  ;;  %v416_v9 = vld [vmem:[#allocation3 + $0x78] sm:$0xff]  ;;  %v486_v10 = vld [vmem:[#allocation3 + $0xa8] sm:$0xff]  ;;  %v415_v11 = vld [vmem:[#allocation3 + $0x70] sm:$0xff] }
  0x20   :  { %241 = vmatpush.msra.mxu0 %v194_v15  ;;  %361 = vmatpush.msrb.mxu1 %v341_v60  ;;  %v485_v12 = vld [vmem:[#allocation3 + $0xa0] sm:$0xff]  ;;  %v414_v13 = vld [vmem:[#allocation3 + $0x68] sm:$0xff]  ;;  %v484_v14 = vld [vmem:[#allocation3 + $0x98] sm:$0xff] }
  0x21   :  { %505 = vmatpush.msra.mxu3 %v486_v10  ;;  %v413_v15 = vld [vmem:[#allocation3 + $0x60] sm:$0xff]  ;;  %v631_v25 = vld [vmem:[#allocation3 + $0x130] sm:$0xff]  ;;  %v630_v26 = vld [vmem:[#allocation3 + $0x128] sm:$0xff] }
  0x22   :  { %242 = vmatpush.msra.mxu0 %v193_v16  ;;  %362 = vmatpush.msrb.mxu1 %v340_v62  ;;  %v483_v16 = vld [vmem:[#allocation3 + $0x90] sm:$0xff]  ;;  %v629_v27 = vld [vmem:[#allocation3 + $0x120] sm:$0xff]  ;;  %v628_v28 = vld [vmem:[#allocation3 + $0x118] sm:$0xff] }
  0x23   :  { %506 = vmatpush.msra.mxu3 %v485_v12  ;;  %v918_v58 = vld [vmem:[#allocation3 + $0x228] sm:$0xff]  ;;  %v917_v61 = vld [vmem:[#allocation3 + $0x220] sm:$0xff]  ;;  %v848_v10 = vld [vmem:[#allocation3 + $0x1f8] sm:$0xff] }
  0x24   :  { %363 = vmatpush.msrb.mxu1 %v339_v0  ;;  %v702_v60 = vld [vmem:[#allocation3 + $0x168] sm:$0xff]  ;;  %v701_v62 = vld [vmem:[#allocation3 + $0x160] sm:$0xff]  ;;  %v700_v0 = vld [vmem:[#allocation3 + $0x158] sm:$0xff] }
  0x25   :  { %507 = vmatpush.msra.mxu3 %v484_v14  ;;  %v913_v8 = vld [vmem:[#allocation3 + $0x200] sm:$0xff]  ;;  %v847_v12 = vld [vmem:[#allocation3 + $0x1f0] sm:$0xff]  ;;  %v846_v14 = vld [vmem:[#allocation3 + $0x1e8] sm:$0xff] }
  0x26   :  { %364 = vmatpush.msrb.mxu1 %v338_v1 }
  0x27   :  { %508 = vmatpush.msra.mxu3 %v483_v16  ;;  %v844_v16 = vld [vmem:[#allocation3 + $0x1d8] sm:$0xff] }
  0x28   :  { %365 = vmatpush.msrb.mxu1 %v337_v3  ;;  %v915_v3 = vld [vmem:[#allocation3 + $0x210] sm:$0xff] }
  0x2a   :  { %366 = vmatpush.msrb.mxu1 %v336_v4  ;;  %v699_v4 = vld [vmem:[#allocation3 + $0x150] sm:$0xff] }
  0x6b   :  { %v125_v22 = vpop.permute.xlu2 %124 }
  0x6c   :  { %vm127_vm5 = vcmp.lt.s32.totalorder %v105_v20, %v125_v22  ;;  %v410_v22 = vld [vmem:[#allocation3 + $0x48] sm:$0xff] }
  0x73   :  { %v140_v24 = vpop.permute.xlu2 %139 }
  0x82   :  { %v135_v19 = vpop.permute.xlu1 %134 }
  0x83   :  { %v112_v18 = vpop.permute.xlu0 %111 }
  0x84   :  { %vm116_vm3 = vcmp.ge.s32.totalorder %v105_v20, %v112_v18  ;;  %v412_v18 = vld [vmem:[#allocation3 + $0x58] sm:$0xff] }
  0x8a   :  { %v115_v23 = vpop.permute.xlu1 %114 }
  0x8b   :  { %v122_v21 = vpop.permute.xlu0 %121  ;;  %vm117_vm6 = vcmp.ge.s32.totalorder %v105_v20, %v115_v23  ;;  %v632_v23 = vld [vmem:[#allocation3 + $0x138] sm:$0xff] }
  0x8c   :  { %vm126_vm2 = vcmp.lt.s32.totalorder %v105_v20, %v122_v21  ;;  %vm129_vm7 = vmand %vm117_vm6, %vm127_vm5  ;;  %v411_v20 = vld [vmem:[#allocation3 + $0x50] sm:$0xff]  ;;  %v481_v21 = vld [vmem:[#allocation3 + $0x80] sm:$0xff] }
  0x8d   :  { %vm128_vm4 = vmand %vm116_vm3, %vm126_vm2 }
  0x8e   :  { %1263 = vmatmul.msk.f32.vlgmr.msra.gmra.mxu0 %vm128_vm4, %v135_v19  ;;  %v482_v19 = vld [vmem:[#allocation3 + $0x88] sm:$0xff] }
  0x8f   :  { %509 = vmatpush.msra.mxu3 %v482_v19  ;;  %v843_v19 = vld [vmem:[#allocation3 + $0x1d0] sm:$0xff] }
  0x91   :  { %510 = vmatpush.msra.mxu3 %v481_v21  ;;  %v842_v21 = vld [vmem:[#allocation3 + $0x1c8] sm:$0xff] }
  0x93   :  { %647 = vmatpush.msrb.mxu3 %v632_v23  ;;  %v992_v23 = vld [vmem:[#allocation3 + $0x278] sm:$0xff] }
  0x95   :  { %648 = vmatpush.msrb.mxu3 %v631_v25  ;;  %v991_v25 = vld [vmem:[#allocation3 + $0x270] sm:$0xff] }
  0x96   :  { %1264 = vmatmul.msk.f32.gmra.mxu0 %vm129_vm7, %v140_v24  ;;  %v409_v24 = vld [vmem:[#allocation3 + $0x40] sm:$0xff] }
  0x97   :  { %649 = vmatpush.msrb.mxu3 %v630_v26 }
  0x99   :  { %650 = vmatpush.msrb.mxu3 %v629_v27  ;;  %v990_v27 = vld [vmem:[#allocation3 + $0x268] sm:$0xff] }
  0x9b   :  { %651 = vmatpush.msrb.mxu3 %v628_v28  ;;  %v989_v28 = vld [vmem:[#allocation3 + $0x260] sm:$0xff] }
 0x10b   :  { %v244_v30 = vpop.f32.mrf.mxu0 }
 0x10c   :  { %v250_v31 = vadd.f32 %v244_v30, %v225_v29  ;;  %v627_v29 = vld [vmem:[#allocation3 + $0x110] sm:$0xff]  ;;  %v626_v30 = vld [vmem:[#allocation3 + $0x108] sm:$0xff] }
 0x10d   :  { %652 = vmatpush.msrb.mxu3 %v627_v29  ;;  %v988_v29 = vld [vmem:[#allocation3 + $0x258] sm:$0xff] }
 0x10e   :  { %253 = vst.msk [vmem:[#allocation2] sm:$0xff] %vm99_vm1, %v250_v31 }
 0x10f   :  { %653 = vmatpush.msrb.mxu3 %v626_v30 }
 0x113   :  { %v247_v33 = vpop.f32.mrf.mxu0 }
 0x114   :  { %v251_v34 = vadd.f32 %v247_v33, %v226_v32  ;;  %v625_v32 = vld [vmem:[#allocation3 + $0x100] sm:$0xff]  ;;  %v776_v33 = vld [vmem:[#allocation3 + $0x1b8] sm:$0xff] }
 0x115   :  { %v259_v35 = vld [vmem:[#allocation2] sm:$0xff]  ;;  %654 = vmatpush.msrb.mxu3 %v625_v32  ;;  %v986_v32 = vld [vmem:[#allocation3 + $0x248] sm:$0xff] }
 0x116   :  { %255 = vst.msk [vmem:[#allocation2 + $0x8] sm:$0xf] %vm101_vm8, %v251_v34  ;;  %1265 = vmatmul.msk.f32.vlgmr.msra.gmra.mxu1 %vm99_vm1, %v259_v35  ;;  %v560_v34 = vld [vmem:[#allocation3 + $0xf8] sm:$0xff] }
 0x117   :  { %431 = vmatpush.msra.mxu1 %v416_v9  ;;  %v697_v9 = vld [vmem:[#allocation3 + $0x140] sm:$0xff] }
 0x119   :  { %432 = vmatpush.msra.mxu1 %v415_v11 }
 0x11b   :  { %433 = vmatpush.msra.mxu1 %v414_v13 }
 0x11d   :  { %v260_v36 = vld [vmem:[#allocation2 + $0x8] sm:$0xf]  ;;  %434 = vmatpush.msra.mxu1 %v413_v15  ;;  %v845_v15 = vld [vmem:[#allocation3 + $0x1e0] sm:$0xff] }
 0x11e   :  { %1266 = vmatmul.msk.f32.gmra.mxu1 %vm99_vm1, %v260_v36  ;;  %v775_v36 = vld [vmem:[#allocation3 + $0x1b0] sm:$0xff] }
 0x11f   :  { %435 = vmatpush.msra.mxu1 %v412_v18 }
 0x121   :  { %436 = vmatpush.msra.mxu1 %v411_v20 }
 0x123   :  { %437 = vmatpush.msra.mxu1 %v410_v22  ;;  %v841_v22 = vld [vmem:[#allocation3 + $0x1c0] sm:$0xff] }
 0x125   :  { %438 = vmatpush.msra.mxu1 %v409_v24 }
 0x193   :  { %v292_v37 = vpop.f32.mrf.mxu1 }
 0x194   :  { %v293_v41 = vadd.f32 %v1356_v38, %v292_v37  ;;  %v559_v37 = vld [vmem:[#allocation3 + $0xf0] sm:$0xff] }
 0x19b   :  { %v295_v39 = vpop.f32.mrf.mxu1 }
 0x19c   :  { %v296_v40 = vadd.f32 %v1356_v38, %v295_v39  ;;  %v774_v38 = vld [vmem:[#allocation3 + $0x1a8] sm:$0xff] }
 0x19e   :  { %1267 = vmatpush.msk.msra.mxu2 %vm309_vm9, %v296_v40  ;;  %1281 = vmatpush.msk.msrb.mxu0 %vm309_vm9, %v296_v40 }
 0x1a0   :  { %328 = vmatpush.msra.mxu2 %v293_v41  ;;  %472 = vmatpush.msrb.mxu0 %v293_v41 }
 0x1a1   :  { %1268 = vmatmul.msk.f32.vlgmr.msra.gmra.mxu2 %vm302_vm10, %v300_v42  ;;  %1282 = vmatmul.msk.f32.vlgmr.msrb.gmra.mxu0 %vm302_vm10, %v1279_v43  ;;  %v557_v42 = vld [vmem:[#allocation3 + $0xe0] sm:$0xff]  ;;  %v772_v43 = vld [vmem:[#allocation3 + $0x198] sm:$0xff] }
 0x1a2   :  { %1274 = vmatpush.msk.msrb.mxu2 %vm309_vm9, %v296_v40  ;;  %1295 = vmatpush.msk.msra.mxu0 %vm309_vm9, %v296_v40 }
 0x1a4   :  { %400 = vmatpush.msrb.mxu2 %v293_v41  ;;  %616 = vmatpush.msra.mxu0 %v293_v41 }
 0x1a6   :  { %1288 = vmatpush.msk.msra.mxu2 %vm309_vm9, %v296_v40  ;;  %1309 = vmatpush.msk.msrb.mxu0 %vm309_vm9, %v296_v40 }
 0x1a8   :  { %544 = vmatpush.msra.mxu2 %v293_v41  ;;  %760 = vmatpush.msrb.mxu0 %v293_v41 }
 0x1a9   :  { %1269 = vmatmul.msk.f32.gmra.mxu2 %vm302_vm10, %v301_v44  ;;  %1283 = vmatmul.msk.f32.gmra.mxu0 %vm302_vm10, %v1280_v45  ;;  %v556_v44 = vld [vmem:[#allocation3 + $0xd8] sm:$0xff] }
 0x1b1   :  { %1275 = vmatmul.msk.f32.vlgmr.msrb.gmra.mxu2 %vm302_vm10, %v1272_v46  ;;  %1296 = vmatmul.msk.f32.vlgmr.msra.gmra.mxu0 %vm302_vm10, %v1293_v47  ;;  %v771_v46 = vld [vmem:[#allocation3 + $0x190] sm:$0xff] }
 0x1b2   :  { %1302 = vmatpush.msk.msrb.mxu2 %vm309_vm9, %v296_v40  ;;  %1323 = vmatpush.msk.msra.mxu0 %vm309_vm9, %v296_v40  ;;  %v555_v47 = vld [vmem:[#allocation3 + $0xd0] sm:$0xff] }
 0x1b4   :  { %688 = vmatpush.msrb.mxu2 %v293_v41  ;;  %904 = vmatpush.msra.mxu0 %v293_v41 }
 0x1b9   :  { %1276 = vmatmul.msk.f32.gmra.mxu2 %vm302_vm10, %v1273_v48  ;;  %1297 = vmatmul.msk.f32.gmra.mxu0 %vm302_vm10, %v1294_v49  ;;  %v770_v48 = vld [vmem:[#allocation3 + $0x188] sm:$0xff] }
 0x1c1   :  { %1289 = vmatmul.msk.f32.vlgmr.msra.gmra.mxu2 %vm302_vm10, %v1286_v50  ;;  %1310 = vmatmul.msk.f32.vlgmr.msrb.gmra.mxu0 %vm302_vm10, %v1307_v51  ;;  %v554_v50 = vld [vmem:[#allocation3 + $0xc8] sm:$0xff]  ;;  %v769_v51 = vld [vmem:[#allocation3 + $0x180] sm:$0xff] }
 0x1c2   :  { %1316 = vmatpush.msk.msra.mxu2 %vm309_vm9, %v296_v40 }
 0x1c4   :  { %832 = vmatpush.msra.mxu2 %v293_v41 }
 0x1c9   :  { %1290 = vmatmul.msk.f32.gmra.mxu2 %vm302_vm10, %v1287_v52  ;;  %1311 = vmatmul.msk.f32.gmra.mxu0 %vm302_vm10, %v1308_v53  ;;  %v920_v52 = vld [vmem:[#allocation3 + $0x238] sm:$0xff]  ;;  %v553_v53 = vld [vmem:[#allocation3 + $0xc0] sm:$0xff] }
 0x1d1   :  { %1303 = vmatmul.msk.f32.vlgmr.msrb.gmra.mxu2 %vm302_vm10, %v1300_v54  ;;  %1324 = vmatmul.msk.f32.vlgmr.msra.gmra.mxu0 %vm302_vm10, %v1321_v55  ;;  %v704_v54 = vld [vmem:[#allocation3 + $0x178] sm:$0xff] }
 0x1d2   :  { %1330 = vmatpush.msk.msrb.mxu2 %vm309_vm9, %v296_v40  ;;  %v558_v40 = vld [vmem:[#allocation3 + $0xe8] sm:$0xff] }
 0x1d4   :  { %976 = vmatpush.msrb.mxu2 %v293_v41  ;;  %v773_v41 = vld [vmem:[#allocation3 + $0x1a0] sm:$0xff] }
 0x1d9   :  { %1304 = vmatmul.msk.f32.gmra.mxu2 %vm302_vm10, %v1301_v56  ;;  %1325 = vmatmul.msk.f32.gmra.mxu0 %vm302_vm10, %v1322_v57  ;;  %v919_v56 = vld [vmem:[#allocation3 + $0x230] sm:$0xff] }
 0x1da   :  { %v703_v57 = vld [vmem:[#allocation3 + $0x170] sm:$0xff] }
 0x1e1   :  { %1317 = vmatmul.msk.f32.vlgmr.msra.gmra.mxu2 %vm302_vm10, %v1314_v63  ;;  %v916_v63 = vld [vmem:[#allocation3 + $0x218] sm:$0xff] }
 0x1e9   :  { %1318 = vmatmul.msk.f32.gmra.mxu2 %vm302_vm10, %v1315_v5  ;;  %v914_v5 = vld [vmem:[#allocation3 + $0x208] sm:$0xff] }
 0x1f1   :  { %1331 = vmatmul.msk.f32.vlgmr.msrb.gmra.mxu2 %vm302_vm10, %v1328_v6 }
 0x1f9   :  { %1332 = vmatmul.msk.f32.gmra.mxu2 %vm302_vm10, %v1329_v7  ;;  %v698_v7 = vld [vmem:[#allocation3 + $0x148] sm:$0xff] }
 0x21e   :  { %v474_v31 = vpop.f32.mrf.mxu0 }
 0x21f   :  { %1284 = vmatmul.msk.f32.vlgmr.msra.gmra.mxu3 %vm344_vm11, %v474_v31  ;;  %v987_v31 = vld [vmem:[#allocation3 + $0x250] sm:$0xff] }
 0x220   :  { %791 = vmatpush.msra.mxu3 %v776_v33  ;;  %v985_v33 = vld [vmem:[#allocation3 + $0x240] sm:$0xff] }
 0x222   :  { %792 = vmatpush.msra.mxu3 %v775_v36 }
 0x224   :  { %v330_v35 = vpop.f32.mrf.mxu2  ;;  %793 = vmatpush.msra.mxu3 %v774_v38 }
 0x225   :  { %1270 = vmatmul.msk.f32.vlgmr.msrb.gmra.mxu1 %vm344_vm11, %v330_v35 }
 0x226   :  { %575 = vmatpush.msrb.mxu1 %v560_v34  ;;  %v477_v39 = vpop.f32.mrf.mxu0  ;;  %794 = vmatpush.msra.mxu3 %v773_v41 }
 0x227   :  { %1285 = vmatmul.msk.f32.gmra.mxu3 %vm344_vm11, %v477_v39 }
 0x228   :  { %576 = vmatpush.msrb.mxu1 %v559_v37  ;;  %795 = vmatpush.msra.mxu3 %v772_v43 }
 0x22a   :  { %577 = vmatpush.msrb.mxu1 %v558_v40  ;;  %796 = vmatpush.msra.mxu3 %v771_v46  ;;  %v1033_v46 = vld [vmem:[%s1885_s9 + $0x38] sm:$0xff] }
 0x22b   :  { %1048 = vmatpush.msrb.mxu0 %v1033_v46  ;;  %v1106_v46 = vld [vmem:[%s1886_s10 + $0x28] sm:$0xff] }
 0x22c   :  { %v333_v45 = vpop.f32.mrf.mxu2  ;;  %578 = vmatpush.msrb.mxu1 %v557_v42  ;;  %797 = vmatpush.msra.mxu3 %v770_v48 }
 0x22d   :  { %1271 = vmatmul.msk.f32.gmra.mxu1 %vm344_vm11, %v333_v45 }
 0x22e   :  { %579 = vmatpush.msrb.mxu1 %v556_v44  ;;  %v618_v49 = vpop.f32.mrf.mxu0  ;;  %798 = vmatpush.msra.mxu3 %v769_v51  ;;  %v1029_v51 = vld [vmem:[%s1885_s9 + $0x18] sm:$0xff] }
 0x22f   :  { %1298 = vmatmul.msk.f32.vlgmr.msrb.gmra.mxu3 %vm344_vm11, %v618_v49  ;;  %v1031_v49 = vld [vmem:[%s1885_s9 + $0x28] sm:$0xff] }
 0x230   :  { %580 = vmatpush.msrb.mxu1 %v555_v47  ;;  %935 = vmatpush.msrb.mxu3 %v920_v52  ;;  %v1032_v47 = vld [vmem:[%s1885_s9 + $0x30] sm:$0xff] }
 0x231   :  { %1049 = vmatpush.msrb.mxu0 %v1032_v47  ;;  %v1338_v47 = vsel %vm1069_vm12, 1.0, %v1471_v17 }
 0x232   :  { %581 = vmatpush.msrb.mxu1 %v554_v50  ;;  %936 = vmatpush.msrb.mxu3 %v919_v56  ;;  %v1030_v50 = vld [vmem:[%s1885_s9 + $0x20] sm:$0xff] }
 0x233   :  { %1050 = vmatpush.msrb.mxu0 %v1031_v49  ;;  %v1026_v56 = vld [vmem:[%s1885_s9] sm:$0xff] }
 0x234   :  { %v402_v55 = vpop.f32.mrf.mxu2  ;;  %582 = vmatpush.msrb.mxu1 %v553_v53  ;;  %937 = vmatpush.msrb.mxu3 %v918_v58  ;;  %v1028_v53 = vld [vmem:[%s1885_s9 + $0x10] sm:$0xff]  ;;  %v1105_v49 = vld [vmem:[%s1886_s10 + $0x20] sm:$0xff] }
 0x235   :  { %1277 = vmatmul.msk.f32.vlgmr.msra.gmra.mxu1 %vm344_vm11, %v402_v55  ;;  %1051 = vmatpush.msrb.mxu0 %v1030_v50  ;;  %v1027_v55 = vld [vmem:[%s1885_s9 + $0x8] sm:$0xff]  ;;  %s1248_s9 = sshll.u32 %s1890_s14, 4  ;;  %s1249_s9 = int_to_ptr.hbm [resolvable:$true] %s1248_s9 }
 0x236   :  { %719 = vmatpush.msra.mxu1 %v704_v54  ;;  %v621_v59 = vpop.f32.mrf.mxu0  ;;  %938 = vmatpush.msrb.mxu3 %v917_v61 }
 0x237   :  { %1299 = vmatmul.msk.f32.gmra.mxu3 %vm344_vm11, %v621_v59  ;;  %1052 = vmatpush.msrb.mxu0 %v1029_v51 }
 0x238   :  { %720 = vmatpush.msra.mxu1 %v703_v57  ;;  %939 = vmatpush.msrb.mxu3 %v916_v63  ;;  %v298_v57 = vld [vmem:[%s1884_s8] sm:$0xff] }
 0x239   :  { %1053 = vmatpush.msrb.mxu0 %v1028_v53  ;;  %v1104_v53 = vld [vmem:[%s1886_s10 + $0x18] sm:$0xff] }
 0x23a   :  { %721 = vmatpush.msra.mxu1 %v702_v60  ;;  %940 = vmatpush.msrb.mxu3 %v915_v3 }
 0x23b   :  { %1054 = vmatpush.msrb.mxu0 %v1027_v55  ;;  %v1102_v55 = vld [vmem:[%s1886_s10 + $0x8] sm:$0xff] }
 0x23c   :  { %v405_v1 = vpop.f32.mrf.mxu2  ;;  %722 = vmatpush.msra.mxu1 %v701_v62  ;;  %941 = vmatpush.msrb.mxu3 %v914_v5  ;;  %v299_v62 = vld [vmem:[%s1884_s8 + $0x8] sm:$0xf] }
 0x23d   :  { %1278 = vmatmul.msk.f32.gmra.mxu1 %vm344_vm11, %v405_v1  ;;  %1055 = vmatpush.msrb.mxu0 %v1026_v56  ;;  %v1123_v1 = vld [vmem:[%s1886_s10 + $0xb0] sm:$0xff]  ;;  %v1122_v5 = vld [vmem:[%s1886_s10 + $0xa8] sm:$0xff] }
 0x23e   :  { %723 = vmatpush.msra.mxu1 %v700_v0  ;;  %v762_v6 = vpop.f32.mrf.mxu0  ;;  %942 = vmatpush.msrb.mxu3 %v913_v8  ;;  %v1124_v0 = vld [vmem:[%s1886_s10 + $0xb8] sm:$0xff] }
 0x23f   :  { %1312 = vmatmul.msk.f32.vlgmr.msra.gmra.mxu3 %vm344_vm11, %v762_v6  ;;  %1164 = vmatpush.msra.mxu2 %v1124_v0 }
 0x240   :  { %724 = vmatpush.msra.mxu1 %v699_v4 }
 0x241   :  { %1165 = vmatpush.msra.mxu2 %v1123_v1 }
 0x242   :  { %725 = vmatpush.msra.mxu1 %v698_v7 }
 0x243   :  { %1166 = vmatpush.msra.mxu2 %v1122_v5 }
 0x244   :  { %v546_v11 = vpop.f32.mrf.mxu2  ;;  %726 = vmatpush.msra.mxu1 %v697_v9  ;;  %v1121_v9 = vld [vmem:[%s1886_s10 + $0xa0] sm:$0xff] }
 0x245   :  { %1291 = vmatmul.msk.f32.vlgmr.msrb.gmra.mxu1 %vm344_vm11, %v546_v11  ;;  %v1120_v11 = vld [vmem:[%s1886_s10 + $0x98] sm:$0xff]  ;;  %1167 = vmatpush.msra.mxu2 %v1121_v9 }
 0x246   :  { %863 = vmatpush.msrb.mxu1 %v848_v10  ;;  %v765_v13 = vpop.f32.mrf.mxu0 }
 0x247   :  { %1313 = vmatmul.msk.f32.gmra.mxu3 %vm344_vm11, %v765_v13  ;;  %1168 = vmatpush.msra.mxu2 %v1120_v11 }
 0x248   :  { %864 = vmatpush.msrb.mxu1 %v847_v12 }
 0x24a   :  { %865 = vmatpush.msrb.mxu1 %v846_v14  ;;  %v1119_v14 = vld [vmem:[%s1886_s10 + $0x90] sm:$0xff] }
 0x24b   :  { %1169 = vmatpush.msra.mxu2 %v1119_v14 }
 0x24c   :  { %v549_v18 = vpop.f32.mrf.mxu2  ;;  %866 = vmatpush.msrb.mxu1 %v845_v15 }
 0x24d   :  { %1292 = vmatmul.msk.f32.gmra.mxu1 %vm344_vm11, %v549_v18 }
 0x24e   :  { %867 = vmatpush.msrb.mxu1 %v844_v16  ;;  %v906_v20 = vpop.f32.mrf.mxu0 }
 0x24f   :  { %1326 = vmatmul.msk.f32.vlgmr.msrb.gmra.mxu3 %vm344_vm11, %v906_v20 }
 0x250   :  { %868 = vmatpush.msrb.mxu1 %v843_v19 }
 0x252   :  { %869 = vmatpush.msrb.mxu1 %v842_v21 }
 0x254   :  { %v690_v24 = vpop.f32.mrf.mxu2  ;;  %870 = vmatpush.msrb.mxu1 %v841_v22 }
 0x255   :  { %1305 = vmatmul.msk.f32.vlgmr.msra.gmra.mxu1 %vm344_vm11, %v690_v24 }
 0x256   :  { %1007 = vmatpush.msra.mxu1 %v992_v23  ;;  %v909_v26 = vpop.f32.mrf.mxu0 }
 0x257   :  { %1327 = vmatmul.msk.f32.gmra.mxu3 %vm344_vm11, %v909_v26 }
 0x258   :  { %1008 = vmatpush.msra.mxu1 %v991_v25 }
 0x25a   :  { %1009 = vmatpush.msra.mxu1 %v990_v27 }
 0x25c   :  { %v693_v30 = vpop.f32.mrf.mxu2  ;;  %1010 = vmatpush.msra.mxu1 %v989_v28 }
 0x25d   :  { %1306 = vmatmul.msk.f32.gmra.mxu1 %vm344_vm11, %v693_v30 }
 0x25e   :  { %1011 = vmatpush.msra.mxu1 %v988_v29 }
 0x260   :  { %1012 = vmatpush.msra.mxu1 %v987_v31 }
 0x262   :  { %1013 = vmatpush.msra.mxu1 %v986_v32 }
 0x264   :  { %v834_v34 = vpop.f32.mrf.mxu2  ;;  %1014 = vmatpush.msra.mxu1 %v985_v33 }
 0x265   :  { %1319 = vmatmul.msk.f32.vlgmr.msrb.gmra.mxu1 %vm344_vm11, %v834_v34  ;;  %v1118_v34 = vld [vmem:[%s1886_s10 + $0x88] sm:$0xff] }
 0x266   :  { %1170 = vmatpush.msra.mxu2 %v1118_v34 }
 0x26c   :  { %v837_v35 = vpop.f32.mrf.mxu2 }
 0x26d   :  { %1320 = vmatmul.msk.f32.gmra.mxu1 %vm344_vm11, %v837_v35  ;;  %v1117_v35 = vld [vmem:[%s1886_s10 + $0x80] sm:$0xff] }
 0x26e   :  { %1171 = vmatpush.msra.mxu2 %v1117_v35 }
 0x274   :  { %v978_v36 = vpop.f32.mrf.mxu2 }
 0x275   :  { %1333 = vmatmul.msk.f32.vlgmr.msra.gmra.mxu1 %vm344_vm11, %v978_v36  ;;  %v1116_v36 = vld [vmem:[%s1886_s10 + $0x78] sm:$0xff] }
 0x276   :  { %1133 = vmatpush.msra.mxu3 %v1116_v36 }
 0x27c   :  { %v981_v37 = vpop.f32.mrf.mxu2 }
 0x27d   :  { %1334 = vmatmul.msk.f32.gmra.mxu1 %vm344_vm11, %v981_v37  ;;  %v1115_v37 = vld [vmem:[%s1886_s10 + $0x70] sm:$0xff] }
 0x27e   :  { %1134 = vmatpush.msra.mxu3 %v1115_v37 }
 0x2a2   :  { %v368_v38 = vpop.f32.mrf.mxu1  ;;  %v512_v40 = vpop.f32.mrf.mxu3 }
 0x2a3   :  { %v374_v59 = vadd.f32 %v368_v38, %v298_v57  ;;  %v1114_v38 = vld [vmem:[%s1886_s10 + $0x68] sm:$0xff] }
 0x2a4   :  { %1135 = vmatpush.msra.mxu3 %v1114_v38 }
 0x2aa   :  { %v371_v39 = vpop.f32.mrf.mxu1  ;;  %v515_v43 = vpop.f32.mrf.mxu3 }
 0x2ab   :  { %v375_v3 = vadd.f32 %v371_v39, %v299_v62  ;;  %v1113_v39 = vld [vmem:[%s1886_s10 + $0x60] sm:$0xff]  ;;  %v1337_v62 = vsel %vm1063_vm15, 1.0, %v1471_v17 }
 0x2ac   :  { %1136 = vmatpush.msra.mxu3 %v1113_v39 }
 0x2b2   :  { %v440_v41 = vpop.f32.mrf.mxu1  ;;  %v656_v45 = vpop.f32.mrf.mxu3 }
 0x2b3   :  { %v446_v61 = vadd.f32 %v440_v41, %v374_v59  ;;  %v1111_v41 = vld [vmem:[%s1886_s10 + $0x50] sm:$0xff] }
 0x2b5   :  { %v518_v63 = vadd.f32 %v512_v40, %v446_v61  ;;  %v1112_v40 = vld [vmem:[%s1886_s10 + $0x58] sm:$0xff]  ;;  %v1101_v61 = vld [vmem:[%s1886_s10] sm:$0xff] }
 0x2b6   :  { %1137 = vmatpush.msra.mxu3 %v1112_v40 }
 0x2b8   :  { %1138 = vmatpush.msra.mxu3 %v1111_v41 }
 0x2ba   :  { %v443_v42 = vpop.f32.mrf.mxu1  ;;  %v659_v52 = vpop.f32.mrf.mxu3 }
 0x2bb   :  { %v447_v8 = vadd.f32 %v443_v42, %v375_v3  ;;  %v1110_v42 = vld [vmem:[%s1886_s10 + $0x48] sm:$0xff] }
 0x2bc   :  { %1139 = vmatpush.msra.mxu3 %v1110_v42 }
 0x2bd   :  { %v519_v12 = vadd.f32 %v515_v43, %v447_v8  ;;  %v1109_v43 = vld [vmem:[%s1886_s10 + $0x40] sm:$0xff] }
 0x2be   :  { %1140 = vmatpush.msra.mxu3 %v1109_v43 }
 0x2c2   :  { %v584_v44 = vpop.f32.mrf.mxu1  ;;  %v800_v58 = vpop.f32.mrf.mxu3 }
 0x2c3   :  { %v590_v4 = vadd.f32 %v584_v44, %v518_v63  ;;  %v1108_v44 = vld [vmem:[%s1886_s10 + $0x38] sm:$0xff] }
 0x2c4   :  { %1141 = vmatpush.msra.mxu3 %v1108_v44 }
 0x2c5   :  { %v662_v10 = vadd.f32 %v656_v45, %v590_v4  ;;  %v1107_v45 = vld [vmem:[%s1886_s10 + $0x30] sm:$0xff] }
 0x2c6   :  { %1142 = vmatpush.msra.mxu3 %v1107_v45 }
 0x2c8   :  { %1143 = vmatpush.msra.mxu3 %v1106_v46 }
 0x2ca   :  { %v587_v48 = vpop.f32.mrf.mxu1  ;;  %v803_v6 = vpop.f32.mrf.mxu3  ;;  %1144 = vmatpush.msra.mxu3 %v1105_v49 }
 0x2cb   :  { %v591_v15 = vadd.f32 %v587_v48, %v519_v12  ;;  %v146_v48 = vadd.s32 8, %v1568_v2 }
 0x2cc   :  { %1145 = vmatpush.msra.mxu3 %v1104_v53 }
 0x2cd   :  { %v663_v20 = vadd.f32 %v659_v52, %v591_v15  ;;  %vm1072_vm13 = vcmp.lt.s32.totalorder %v146_v48, 10  ;;  %vm1080_vm14 = vcmp.ge.s32.totalorder %v146_v48, 10 }
 0x2ce   :  { %v1339_v56 = vsel %vm1072_vm13, 1.0, %v1471_v17  ;;  %v1340_v57 = vsel %vm1080_vm14, 1.0, %v1471_v17  ;;  %v1126_v17 = vld [vmem:[%s1887_s11 + $0x8] sm:$0xf] }
 0x2d2   :  { %v728_v54 = vpop.f32.mrf.mxu1  ;;  %v944_v19 = vpop.f32.mrf.mxu3 }
 0x2d3   :  { %v734_v13 = vadd.f32 %v728_v54, %v662_v10  ;;  %v1103_v54 = vld [vmem:[%s1886_s10 + $0x10] sm:$0xff] }
 0x2d4   :  { %1146 = vmatpush.msra.mxu3 %v1103_v54 }
 0x2d5   :  { %v806_v18 = vadd.f32 %v800_v58, %v734_v13 }
 0x2d6   :  { %1147 = vmatpush.msra.mxu3 %v1102_v55  ;;  %v1236_v55 = vld [vmem:[#allocation8] sm:$0xff] }
 0x2d8   :  { %1148 = vmatpush.msra.mxu3 %v1101_v61 }
 0x2da   :  { %v731_v60 = vpop.f32.mrf.mxu1  ;;  %v947_v29 = vpop.f32.mrf.mxu3 }
 0x2db   :  { %v735_v22 = vadd.f32 %v731_v60, %v663_v20 }
 0x2dd   :  { %v807_v25 = vadd.f32 %v803_v6, %v735_v22  ;;  %v1125_v6 = vld [vmem:[%s1887_s11] sm:$0xff]  ;;  %s1474_s11 = smov [#allocation9]  }
 0x2de   :  { %s1246_s3 = sshll.u32 %s1474_s11, 4  ;;  %s1247_s3 = int_to_ptr.vmem [resolvable:$true] %s1246_s3 }
 0x2e2   :  { %v872_v7 = vpop.f32.mrf.mxu1 }
 0x2e3   :  { %v878_v21 = vadd.f32 %v872_v7, %v806_v18 }
 0x2e5   :  { %v950_v23 = vadd.f32 %v944_v19, %v878_v21  ;;  %v1473_v19 = vmov 32.0  }
 0x2e6   :  { %1357 = vrcp.f32 %v1473_v19 }
 0x2ea   :  { %v875_v16 = vpop.f32.mrf.mxu1 }
 0x2eb   :  { %v879_v27 = vadd.f32 %v875_v16, %v807_v25 }
 0x2ec   :  { %v1358_v20 = vpop.eup %1357 }
 0x2ed   :  { %v951_v30 = vadd.f32 %v947_v29, %v879_v27  ;;  %v1188_v21 = vmul.f32 32.0, %v1358_v20  ;;  %vm1192_vm0 = vweird.f32 %v1358_v20 }
 0x2ef   :  { %v1189_v22 = vsub.f32 1.0, %v1188_v21 }
 0x2f2   :  { %v1016_v24 = vpop.f32.mrf.mxu1 }
 0x2f3   :  { %v1022_v26 = vadd.f32 %v1016_v24, %v950_v23  ;;  %v1190_v23 = vmul.f32 %v1358_v20, %v1189_v22 }
 0x2f5   :  { %v1024_v28 = vmax.f32 %v1022_v26, 0.0  ;;  %v1191_v24 = vadd.f32 %v1358_v20, %v1190_v23 }
 0x2f7   :  { %1335 = vmatmul.msk.f32.vlgmr.msrb.gmra.mxu0 %vm344_vm11, %v1024_v28  ;;  %v1193_v25 = vsel %vm1192_vm0, %v1358_v20, %v1191_v24 }
 0x2fa   :  { %v1019_v31 = vpop.f32.mrf.mxu1 }
 0x2fb   :  { %v1023_v32 = vadd.f32 %v1019_v31, %v951_v30 }
 0x2fd   :  { %v1025_v33 = vmax.f32 %v1023_v32, 0.0 }
 0x2ff   :  { %1336 = vmatmul.msk.f32.gmra.mxu0 %vm344_vm11, %v1025_v33 }
 0x374   :  { %v1057_v50 = vpop.f32.mrf.mxu0 }
 0x375   :  { %v1087_v51 = vmul.f32 %v1338_v47, %v1057_v50  ;;  %v1089_v52 = vmul.f32 0.0, %v1057_v50  ;;  %v1085_v63 = vmul.f32 %v1337_v62, %v1057_v50  ;;  %v1232_v50 = vld [vmem:[#allocation6] sm:$0xff] }
 0x377   :  { %1341 = vmatmul.msk.f32.vlgmr.msra.gmra.mxu2 %vm344_vm11, %v1089_v52  ;;  %1093 = vrot.lane.b32.xlu0 %v1087_v51, %s1472_s13 }
 0x37c   :  { %v1060_v58 = vpop.f32.mrf.mxu0 }
 0x37d   :  { %v1088_v59 = vmul.f32 %v1339_v56, %v1060_v58  ;;  %v1090_v60 = vmul.f32 %v1340_v57, %v1060_v58  ;;  %v1086_v3 = vmul.f32 0.0, %v1060_v58 }
 0x37f   :  { %1342 = vmatmul.msk.f32.gmra.mxu2 %vm344_vm11, %v1090_v60  ;;  %1095 = vrot.lane.b32.xlu1 %v1088_v59, %s1472_s13  ;;  %v1233_v60 = vld [vmem:[#allocation6 + $0x8] sm:$0xf] }
 0x3e9   :  { %v1094_v0 = vpop.permute.xlu0 %1093 }
 0x3ea   :  { %v1099_v1 = vsel %vm344_vm11, %v1085_v63, %v1094_v0  ;;  %v1237_v63 = vld [vmem:[#allocation8 + $0x8] sm:$0xf] }
 0x3eb   :  { %1149 = vmatmul.f32.vlgmr.msra.gmra.mxu3 %v1099_v1 }
 0x3f1   :  { %v1096_v4 = vpop.permute.xlu1 %1095 }
 0x3f2   :  { %v1100_v5 = vsel %vm344_vm11, %v1086_v3, %v1096_v4 }
 0x3f3   :  { %1152 = vmatmul.f32.gmra.mxu3 %v1100_v5 }
 0x3fa   :  { %v1173_v7 = vpop.f32.mrf.mxu2 }
 0x402   :  { %v1176_v14 = vpop.f32.mrf.mxu2 }
 0x46e   :  { %v1150_v8 = vpop.f32.mrf.mxu3 }
 0x46f   :  { %v1151_v9 = vadd.f32 %v1150_v8, %v1125_v6 }
 0x471   :  { %v1174_v2 = vadd.f32 %v1173_v7, %v1151_v9 }
 0x473   :  { %v1179_v10 = vmax.f32 %v1174_v2, 0.0 }
 0x475   :  { %v1181_v11 = vsel %vm99_vm1, %v1179_v10, 0.0 }
 0x476   :  { %1182 = vadd.xlane.f32.xlu2 %v1181_v11  ;;  %v1153_v12 = vpop.f32.mrf.mxu3 }
 0x477   :  { %v1154_v13 = vadd.f32 %v1153_v12, %v1126_v17 }
 0x479   :  { %v1177_v15 = vadd.f32 %v1176_v14, %v1154_v13 }
 0x47b   :  { %v1180_v16 = vmax.f32 %v1177_v15, 0.0 }
 0x47d   :  { %v1184_v18 = vsel %vm101_vm8, %v1180_v16, 0.0 }
 0x47e   :  { %1185 = vadd.xlane.f32.xlu0 %v1184_v18 }
 0x4e9   :  { %v1183_v26 = vpop.xlane.xlu2 %1182 }
 0x4ea   :  { %v1194_v27 = vmul.f32 %v1193_v25, %v1183_v26 }
 0x4ec   :  { %v1196_v28 = vsub.f32 %v1179_v10, %v1194_v27 }
 0x4ee   :  { %v1198_v29 = vmul.f32 %v1196_v28, %v1196_v28 }
 0x4f0   :  { %v1200_v30 = vsel %vm99_vm1, %v1198_v29, 0.0 }
 0x4f1   :  { %1201 = vadd.xlane.f32.xlu1 %v1200_v30  ;;  %v1186_v31 = vpop.xlane.xlu0 %1185 }
 0x4f2   :  { %v1195_v32 = vmul.f32 %v1193_v25, %v1186_v31 }
 0x4f4   :  { %v1197_v33 = vsub.f32 %v1180_v16, %v1195_v32 }
 0x4f6   :  { %v1199_v34 = vmul.f32 %v1197_v33, %v1197_v33 }
 0x4f8   :  { %v1203_v35 = vsel %vm101_vm8, %v1199_v34, 0.0 }
 0x4f9   :  { %1204 = vadd.xlane.f32.xlu2 %v1203_v35 }
 0x564   :  { %v1202_v36 = vpop.xlane.xlu1 %1201 }
 0x565   :  { %v1206_v37 = vmul.f32 %v1202_v36, %v1193_v25 }
 0x567   :  { %v1208_v38 = vadd.f32 1e-05, %v1206_v37 }
 0x569   :  { %1359 = vrsqrt.f32 %v1208_v38  ;;  %vm1216_vm3 = vweird.f32 %v1208_v38 }
 0x56c   :  { %v1205_v39 = vpop.xlane.xlu2 %1204 }
 0x56d   :  { %v1207_v40 = vmul.f32 %v1205_v39, %v1193_v25 }
 0x56f   :  { %v1360_v41 = vpop.eup %1359  ;;  %v1209_v42 = vadd.f32 1e-05, %v1207_v40 }
 0x570   :  { %v1211_v43 = vmul.f32 %v1360_v41, %v1208_v38  ;;  %vm1217_vm2 = vweird.f32 %v1360_v41 }
 0x571   :  { %1361 = vrsqrt.f32 %v1209_v42  ;;  %vm1218_vm4 = vmor %vm1216_vm3, %vm1217_vm2  ;;  %vm1226_vm6 = vweird.f32 %v1209_v42 }
 0x572   :  { %v1212_v44 = vmul.f32 %v1360_v41, %v1211_v43 }
 0x574   :  { %v1213_v45 = vmul.f32 0.5, %v1212_v44 }
 0x576   :  { %v1214_v46 = vsub.f32 1.5, %v1213_v45 }
 0x577   :  { %v1362_v47 = vpop.eup %1361 }
 0x578   :  { %v1215_v48 = vmul.f32 %v1360_v41, %v1214_v46  ;;  %v1221_v49 = vmul.f32 %v1362_v47, %v1209_v42  ;;  %vm1227_vm5 = vweird.f32 %v1362_v47 }
 0x579   :  { %vm1228_vm7 = vmor %vm1226_vm6, %vm1227_vm5 }
 0x57a   :  { %v1219_v51 = vsel %vm1218_vm4, %v1360_v41, %v1215_v48  ;;  %v1222_v52 = vmul.f32 %v1362_v47, %v1221_v49 }
 0x57b   :  { %v1230_v53 = vmul.f32 %v1219_v51, %v1196_v28 }
 0x57c   :  { %v1223_v54 = vmul.f32 0.5, %v1222_v52 }
 0x57d   :  { %v1234_v56 = vmul.f32 %v1232_v50, %v1230_v53 }
 0x57e   :  { %v1224_v57 = vsub.f32 1.5, %v1223_v54 }
 0x57f   :  { %v1238_v58 = vadd.f32 %v1236_v55, %v1234_v56 }
 0x580   :  { %v1225_v59 = vmul.f32 %v1362_v47, %v1224_v57 }
 0x581   :  { %1240 = vst.msk [vmem:[#allocation9] sm:$0xff] %vm99_vm1, %v1238_v58 }
 0x582   :  { %v1229_v61 = vsel %vm1228_vm7, %v1362_v47, %v1225_v59 }
 0x583   :  { %v1231_v62 = vmul.f32 %v1229_v61, %v1197_v33 }
 0x585   :  { %v1235_v0 = vmul.f32 %v1233_v60, %v1231_v62 }
 0x587   :  { %v1239_v1 = vadd.f32 %v1237_v63, %v1235_v0 }
 0x589   :  { %1241 = vst.msk [vmem:[#allocation9 + $0x8] sm:$0xf] %vm101_vm8, %v1239_v1 }
 0x58a   :  { %1254 = dma.vmem_to_hbm [thread:$0]  %s1247_s3, 256, %s1249_s9, [#allocation5], %s1466_s21, %s1466_s21, %s1467_s22  }
 0x58b   :  { %1463 = dma.done.wait [#allocation5], 256  }
 0x58c   :  { %1464 = vsyncadd [#allocation5], 4294967040 }
 0x58d   :  { %1259 = vsyncpa [#allocation4], 1 }
 0x58e   :  { %1260 = vsyncpa [#allocation7], 1 }
 0x58f   :  { %1261 = vsyncpa [#allocation5], 1 }

</bundles_post_ra>
